<compile_context>
chip_gen: v7x
topology: tpu7x:2x2x1
jax: 0.10.0
libtpu: 0.0.40
codegen_flags: <defaults>
</compile_context>

<pallas_src>
import functools
import math

import jax
import jax.numpy as jnp
from jax import lax
from jax.experimental import pallas as pl
from jax.experimental.pallas import tpu as pltpu


# ----------------------------------------------------------------------------
# Fused Fire kernel: one grid step = `Bt` batch elements; all activations are
# (channels, Bt*H*W) with the flattened spatial axis on the 128 lanes.
# ----------------------------------------------------------------------------
def _fire_kernel(x_ref, wsq_ref, we1_ref, wch_ref, wh_ref, ww_ref, wavg_ref,
                 mask_ref, wlc1_ref, wlc2_ref, wproj_ref, spool_ref, sbc_ref,
                 o_ref, *, H, W, Bt):
    # x_ref    : (Bt, nin, H*W)    NCHW input, spatial flattened on lanes
    # wsq_ref  : (C, nin)          squeeze 1x1 (grouped expansion + shuffle folded in)
    # we1_ref  : (E1, C)           expand1x1
    # wch_ref  : (9, C, 1)         DICE conv_channel taps   [t=kh*3+kw, c]
    # wh_ref   : (9, 1, Bt*H*W)    DICE conv_height taps    [t=kc*3+kw, p]  (w-mask folded)
    # ww_ref   : (9, 1, Bt*H*W)    DICE conv_width  taps    [t=kh*3+kc, p]  (h-mask folded)
    # wavg_ref : (3, C, 1)         weight_avg_layer (groups=C 1x1 after Shuffle(3))
    # mask_ref : (9, 1, Bt*H*W)    validity of spatial shift (kh,kw) (conv_channel & proj)
    # wlc1_ref : (C//4, C)   wlc2_ref : (E3, C//4)
    # wproj_ref: (E3, 9*C)         proj_layer grouped 3x3 as one im2col matrix
    # spool_ref: (Bt*H*W, Bt)      per-sample mean over the padded (H+2)x(W+2) map
    # sbc_ref  : (Bt, Bt*H*W)      per-sample gate broadcast (only used when Bt > 1)
    # o_ref    : (Bt, E1+E3, H*W)
    HW = H * W
    BHW = Bt * HW
    C = wsq_ref.shape[0]

    def shift_sp(v, off):
        # y[:, p] = v[:, (p + off) % BHW]; wrapped positions are zeroed by the callers'
        # masks / mask-folded tap weights.  Lane rotation -> otherwise-idle XLU slot.
        if off == 0:
            return v
        return pltpu.roll(v, (-off) % BHW, axis=v.ndim - 1)

    def shift_ch(v, off):
        # y[c, :] = v[(c + off) % C, :]; the wrapped row is zeroed by the caller.
        if off == 0:
            return v
        return pltpu.roll(v, (-off) % C, axis=0)

    # ---- gather the Bt samples of this step into one lane-dense (nin, Bt*HW) tile ----
    if Bt == 1:
        x = x_ref[0]
    else:
        x = jnp.concatenate([x_ref[b] for b in range(Bt)], axis=-1)

    # ---- squeeze: grouped 1x1 (+ channel shuffle folded into W) + ReLU ----
    sq = jnp.maximum(jnp.dot(wsq_ref[...], x, preferred_element_type=jnp.float32), 0.0)

    # channel-validity masks for the +/-1 channel shifts used by the h-/w-wise convs
    cidx = lax.broadcasted_iota(jnp.int32, (C, 1), 0)
    ch_ok = {-1: (cidx >= 1).astype(jnp.float32),
             1: (cidx <= C - 2).astype(jnp.float32)}

    # ---- DICE branch 1: conv_channel (depthwise 3x3 over H, W) ----
    acc_ch = None
    for i in range(3):
        for j in range(3):
            t = i * 3 + j
            term = (shift_sp(sq, (i - 1) * W + (j - 1)) * mask_ref[t]) * wch_ref[t]
            acc_ch = term if acc_ch is None else acc_ch + term
    # cat -> ReLU -> Shuffle(3) -> grouped 1x1 (groups=C) collapses to three per-channel
    # FMAs; fold the first one immediately so only a single accumulator stays live.
    wacc = wavg_ref[0] * jnp.maximum(acc_ch, 0.0)

    # ---- DICE branches 2 & 3: conv_height / conv_width (share the channel shifts) ----
    acc_h = None
    acc_w = None
    for dc in range(3):
        sqc = sq if dc == 1 else shift_ch(sq, dc - 1) * ch_ok[dc - 1]
        for dw in range(3):
            term = wh_ref[dc * 3 + dw] * shift_sp(sqc, dw - 1)
            acc_h = term if acc_h is None else acc_h + term
        for dh in range(3):
            term = ww_ref[dh * 3 + dc] * shift_sp(sqc, (dh - 1) * W)
            acc_w = term if acc_w is None else acc_w + term
    wacc = wacc + wavg_ref[1] * jnp.maximum(acc_h, 0.0)
    wacc = wacc + wavg_ref[2] * jnp.maximum(acc_w, 0.0)
    wavg = jnp.maximum(wacc, 0.0)                      # (C, Bt*HW) weight_avg interior

    # ---- linear_comb gate: mean over the padded (H+2)x(W+2) map -> 1x1 -> ReLU ->
    #      1x1 -> sigmoid.  The padded map's zero border is accounted for by spool's
    #      1/((H+2)*(W+2)) factor.
    m = jnp.dot(wavg, spool_ref[...], preferred_element_type=jnp.float32)        # (C, Bt)
    h1 = jnp.maximum(jnp.dot(wlc1_ref[...], m, preferred_element_type=jnp.float32), 0.0)
    z = jnp.dot(wlc2_ref[...], h1, preferred_element_type=jnp.float32)           # (E3, Bt)
    gate = 1.0 / (1.0 + jnp.exp(-z))
    if Bt == 1:
        gate_map = gate                                 # (E3, 1) broadcasts over lanes
    else:
        gate_map = jnp.dot(gate, sbc_ref[...], preferred_element_type=jnp.float32)

    # ---- proj_layer: grouped 3x3 (its padding=1 is realized by the tap masks) as ONE
    #      im2col matmul. ----
    cols = jnp.concatenate(
        [shift_sp(wavg, (i - 1) * W + (j - 1)) * mask_ref[i * 3 + j]
         for i in range(3) for j in range(3)], axis=0)                            # (9C, Bt*HW)
    proj = jnp.dot(wproj_ref[...], cols, preferred_element_type=jnp.float32)      # (E3, Bt*HW)
    ex3 = jnp.maximum(proj, 0.0) * gate_map

    # ---- expand1x1 (final Fire ReLU fused; ex3 is already >= 0) ----
    e1 = jnp.maximum(jnp.dot(we1_ref[...], sq, preferred_element_type=jnp.float32), 0.0)

    # ---- cat([expand1x1, expand3x3], channel) and lane-dense stores ----
    full = jnp.concatenate([e1, ex3], axis=0).astype(o_ref.dtype)                 # (Cout, Bt*HW)
    if Bt == 1:
        o_ref[0] = full
    else:
        for b in range(Bt):
            o_ref[b] = full[:, b * HW:(b + 1) * HW]


# ----------------------------------------------------------------------------
# Parameter construction (deterministic, synthetic, kernel-ready layouts)
# ----------------------------------------------------------------------------
def _expand_grouped_pointwise(w, nin, nout, groups):
    # w: (nout, nin//groups) torch-style grouped 1x1 weight -> dense (nin, nout)
    cin_g, cout_g = nin // groups, nout // groups
    full = jnp.zeros((nin, nout), jnp.float32)
    for o in range(nout):
        k = o // cout_g
        full = full.at[k * cin_g:(k + 1) * cin_g, o].set(w[o])
    return full


def _expand_grouped_3x3(w, cin, cout, groups):
    # w: (cout, cin//groups, 3, 3) -> (9, cin, cout) block-diagonal per-tap matrices
    cin_g, cout_g = cin // groups, cout // groups
    taps = jnp.zeros((9, cin, cout), jnp.float32)
    for o in range(cout):
        k = o // cout_g
        for a in range(cin_g):
            taps = taps.at[:, k * cin_g + a, o].set(w[o, a].reshape(9))
    return taps


def init_fire_params(key, nin, squeeze, e1_out, e3_out, height, width, batch_tile=1):
    ks = jax.random.split(key, 9)
    rand = lambda k, shp: 0.1 * jax.random.normal(k, shp, jnp.float32)
    C, H, W, Bt = squeeze, height, width, batch_tile
    HW = H * W

    # squeeze (groupPointwiseConv): groups=1 & no shuffle when nin<=24
    g_sq = math.gcd(nin, squeeze) if nin > 24 else 1
    w_sq_t = rand(ks[0], (squeeze, nin // g_sq))
    w_sq = _expand_grouped_pointwise(w_sq_t, nin, squeeze, g_sq)     # (nin, C)
    if nin > 24 and g_sq > 1:
        cpg = squeeze // g_sq
        perm = jnp.arange(squeeze).reshape(g_sq, cpg).T.reshape(-1)
        w_sq = w_sq[:, perm]            # fold the post-squeeze channel shuffle into W
    w_sq_l = w_sq.T                                                  # (C, nin)

    # expand1x1
    w_e1_l = rand(ks[1], (e1_out, squeeze))                          # (E1, C)

    # flattened-spatial helpers + per-offset validity masks (p = h*W + w)
    h_of_p = jnp.arange(HW) // W
    w_of_p = jnp.arange(HW) % W
    wmask = jnp.stack([((w_of_p + d - 1 >= 0) & (w_of_p + d - 1 < W)) for d in range(3)],
                      axis=-1).astype(jnp.float32)                   # (HW, 3)  [p, dw]
    hmask = jnp.stack([((h_of_p + d - 1 >= 0) & (h_of_p + d - 1 < H)) for d in range(3)],
                      axis=-1).astype(jnp.float32)                   # (HW, 3)  [p, dh]

    def tile_b(a):   # replicate a per-sample spatial map over the Bt samples of a block
        return jnp.tile(a, (1, 1, Bt)) if Bt > 1 else a

    # DICE conv_channel: (C,3,3) -> per-tap per-channel weights
    w_ch = rand(ks[2], (C, 3, 3))
    w_ch_t = w_ch.transpose(1, 2, 0).reshape(9, C, 1)                # [t=kh*3+kw, c, 1]

    # DICE conv_height: (H,3,3) taps [h, kc, kw]; fold the w-validity mask in
    w_h = rand(ks[3], (H, 3, 3))
    wh_map = w_h[h_of_p] * wmask[:, None, :]                         # (HW, 3, 3) [p, kc, kw]
    wh_m = tile_b(wh_map.transpose(1, 2, 0).reshape(9, 1, HW))       # (9, 1, Bt*HW)

    # DICE conv_width: (W,3,3) taps [w, kh, kc]; fold the h-validity mask in
    w_w = rand(ks[4], (W, 3, 3))
    ww_map = w_w[w_of_p] * hmask[:, :, None]                         # (HW, 3, 3) [p, kh, kc]
    ww_m = tile_b(ww_map.transpose(1, 2, 0).reshape(9, 1, HW))       # (9, 1, Bt*HW)

    # spatial validity of the 9 (kh, kw) shifts (shared by conv_channel and proj taps)
    mask9 = tile_b((hmask[:, :, None] * wmask[:, None, :])
                   .transpose(1, 2, 0).reshape(9, 1, HW))            # (9, 1, Bt*HW)

    # weight_avg_layer (groups=C 1x1 on the shuffled 3C concat): y[c]=sum_g wa[c,g]*b_g[c]
    wa = rand(ks[5], (C, 3))
    w_avg = wa.T.reshape(3, C, 1)

    # linear_comb_layer
    w_lc1 = rand(ks[6], (C // 4, C))                                 # (C//4, C)
    w_lc2 = rand(ks[7], (e3_out, C // 4))                            # (E3, C//4)

    # proj_layer: grouped 3x3 (groups = gcd(C, e3_out)) as one (E3, 9C) im2col matrix
    g_proj = math.gcd(C, e3_out)
    w_proj_t = rand(ks[8], (e3_out, C // g_proj, 3, 3))
    taps = _expand_grouped_3x3(w_proj_t, C, e3_out, g_proj)          # (9, C, E3)
    w_proj = taps.transpose(2, 0, 1).reshape(e3_out, 9 * C)          # (E3, 9C)

    # per-sample pooling / broadcast matrices; pooling includes the padded map's zero
    # ring via the 1/((H+2)*(W+2)) factor (matching the PyTorch reference)
    s_pool = jnp.repeat(jnp.eye(Bt, dtype=jnp.float32), HW, axis=0) / float((H + 2) * (W + 2))
    s_bcast = jnp.repeat(jnp.eye(Bt, dtype=jnp.float32), HW, axis=1)

    return dict(w_sq=w_sq_l, w_e1=w_e1_l, w_ch=w_ch_t, w_h_m=wh_m, w_w_m=ww_m,
                w_avg=w_avg, mask9=mask9, w_lc1=w_lc1, w_lc2=w_lc2, w_proj=w_proj,
                s_pool=s_pool, s_bcast=s_bcast)


# ----------------------------------------------------------------------------
# Fire forward (single fused pallas_call, gridded over batch tiles)
# ----------------------------------------------------------------------------
def fire_forward(x_nchw, p, *, height, width, batch_tile=1):
    B, nin, H, W = x_nchw.shape
    assert (H, W) == (height, width)  # DICE resize branches not needed / implemented
    Bt = batch_tile
    assert B % Bt == 0, "batch must be divisible by batch_tile"
    HW = H * W
    BHW = Bt * HW
    C = p["w_sq"].shape[0]
    E1 = p["w_e1"].shape[0]
    E3 = p["w_proj"].shape[0]
    Cout = E1 + E3
    assert p["mask9"].shape[-1] == BHW, "params were built for a different batch_tile"

    # Pure metadata reshape (no XLA transpose, no pad): the kernel works on NCHW with
    # the spatial dims flattened onto the 128-lane axis.
    x = x_nchw.reshape(B, nin, HW)

    kernel = functools.partial(_fire_kernel, H=H, W=W, Bt=Bt)
    out = pl.pallas_call(
        kernel,
        out_shape=jax.ShapeDtypeStruct((B, Cout, HW), jnp.float32),
        grid=(B // Bt,),
        in_specs=[
            pl.BlockSpec((Bt, nin, HW), lambda i: (i, 0, 0)),
            pl.BlockSpec((C, nin), lambda i: (0, 0)),
            pl.BlockSpec((E1, C), lambda i: (0, 0)),
            pl.BlockSpec((9, C, 1), lambda i: (0, 0, 0)),
            pl.BlockSpec((9, 1, BHW), lambda i: (0, 0, 0)),
            pl.BlockSpec((9, 1, BHW), lambda i: (0, 0, 0)),
            pl.BlockSpec((3, C, 1), lambda i: (0, 0, 0)),
            pl.BlockSpec((9, 1, BHW), lambda i: (0, 0, 0)),
            pl.BlockSpec((C // 4, C), lambda i: (0, 0)),
            pl.BlockSpec((E3, C // 4), lambda i: (0, 0)),
            pl.BlockSpec((E3, 9 * C), lambda i: (0, 0)),
            pl.BlockSpec((BHW, Bt), lambda i: (0, 0)),
            pl.BlockSpec((Bt, BHW), lambda i: (0, 0)),
        ],
        out_specs=pl.BlockSpec((Bt, Cout, HW), lambda i: (i, 0, 0)),
        compiler_params=pltpu.CompilerParams(
            dimension_semantics=("parallel",),      # batch steps across TensorCores
            vmem_limit_bytes=32 * 1024 * 1024,      # explicit budget; actual use is tiny
        ),
    )(x, p["w_sq"], p["w_e1"], p["w_ch"], p["w_h_m"], p["w_w_m"], p["w_avg"],
      p["mask9"], p["w_lc1"], p["w_lc2"], p["w_proj"], p["s_pool"], p["s_bcast"])

    return out.reshape(B, Cout, H, W)   # metadata reshape back to NCHW


# ----------------------------------------------------------------------------
if __name__ == "__main__":
    key = jax.random.PRNGKey(0)
    kx, kp = jax.random.split(key)

    B, nin, H, W = 2, 8, 16, 16
    squeeze, e1_out, e3_out = 8, 8, 8
    batch_tile = 1   # raise when B grows to amortize per-step cost / widen matmul N

    x = jax.random.normal(kx, (B, nin, H, W), jnp.float32)
    params = init_fire_params(kp, nin, squeeze, e1_out, e3_out, H, W,
                              batch_tile=batch_tile)

    fwd = jax.jit(functools.partial(fire_forward, height=H, width=W,
                                    batch_tile=batch_tile))
    out = jax.block_until_ready(fwd(x, params))

    assert out.shape == (B, e1_out + e3_out, H, W), out.shape
    assert bool(jnp.all(jnp.isfinite(out)))
    assert bool(jnp.all(out >= 0.0))  # final ReLU
    print("KERNEL_OK")
</pallas_src>

<mosaic_0001>
module attributes {stable_mosaic.version = 11 : i64} {
  func.func @_fire_kernel(%arg0: i32, %arg1: memref<1x8x256xf32, #tpu.memory_space<vmem>>, %arg2: memref<8x8xf32, #tpu.memory_space<vmem>>, %arg3: memref<8x8xf32, #tpu.memory_space<vmem>>, %arg4: memref<9x8x1xf32, #tpu.memory_space<vmem>>, %arg5: memref<9x1x256xf32, #tpu.memory_space<vmem>>, %arg6: memref<9x1x256xf32, #tpu.memory_space<vmem>>, %arg7: memref<3x8x1xf32, #tpu.memory_space<vmem>>, %arg8: memref<9x1x256xf32, #tpu.memory_space<vmem>>, %arg9: memref<2x8xf32, #tpu.memory_space<vmem>>, %arg10: memref<8x2xf32, #tpu.memory_space<vmem>>, %arg11: memref<8x72xf32, #tpu.memory_space<vmem>>, %arg12: memref<256x1xf32, #tpu.memory_space<vmem>>, %arg13: memref<1x256xf32, #tpu.memory_space<vmem>>, %arg14: memref<1x16x256xf32, #tpu.memory_space<vmem>>) attributes {dimension_semantics = [#tpu.dimension_semantics<parallel>], iteration_bounds = array<i64: 2>, scalar_prefetch = 0 : i64, scratch_operands = 0 : i64, tpu.core_type = #tpu.core_type<tc>, window_params = [{transform_indices = @transform_0, window_bounds = array<i64: 1, 8, 256>}, {pipeline_mode = #tpu.pipeline_mode<synchronous>, transform_indices = @transform_1, window_bounds = array<i64: 8, 8>}, {pipeline_mode = #tpu.pipeline_mode<synchronous>, transform_indices = @transform_2, window_bounds = array<i64: 8, 8>}, {pipeline_mode = #tpu.pipeline_mode<synchronous>, transform_indices = @transform_3, window_bounds = array<i64: 9, 8, 1>}, {pipeline_mode = #tpu.pipeline_mode<synchronous>, transform_indices = @transform_4, window_bounds = array<i64: 9, 1, 256>}, {pipeline_mode = #tpu.pipeline_mode<synchronous>, transform_indices = @transform_5, window_bounds = array<i64: 9, 1, 256>}, {pipeline_mode = #tpu.pipeline_mode<synchronous>, transform_indices = @transform_6, window_bounds = array<i64: 3, 8, 1>}, {pipeline_mode = #tpu.pipeline_mode<synchronous>, transform_indices = @transform_7, window_bounds = array<i64: 9, 1, 256>}, {pipeline_mode = #tpu.pipeline_mode<synchronous>, transform_indices = @transform_8, window_bounds = array<i64: 2, 8>}, {pipeline_mode = #tpu.pipeline_mode<synchronous>, transform_indices = @transform_9, window_bounds = array<i64: 8, 2>}, {pipeline_mode = #tpu.pipeline_mode<synchronous>, transform_indices = @transform_10, window_bounds = array<i64: 8, 72>}, {pipeline_mode = #tpu.pipeline_mode<synchronous>, transform_indices = @transform_11, window_bounds = array<i64: 256, 1>}, {pipeline_mode = #tpu.pipeline_mode<synchronous>, transform_indices = @transform_12, window_bounds = array<i64: 1, 256>}, {transform_indices = @transform_13, window_bounds = array<i64: 1, 16, 256>}]} {
    %c0 = arith.constant 0 : index
    %c0_0 = arith.constant 0 : index
    %c0_1 = arith.constant 0 : index
    %0 = vector.load %arg1[%c0, %c0_0, %c0_1] : memref<1x8x256xf32, #tpu.memory_space<vmem>>, vector<1x8x256xf32>
    %1 = vector.shape_cast %0 : vector<1x8x256xf32> to vector<8x256xf32>
    %c0_2 = arith.constant 0 : index
    %c0_3 = arith.constant 0 : index
    %2 = vector.load %arg2[%c0_2, %c0_3] : memref<8x8xf32, #tpu.memory_space<vmem>>, vector<8x8xf32>
    %cst = arith.constant dense<0.000000e+00> : vector<8x256xf32>
    %3 = tpu.matmul %2, %1, %cst {dimension_numbers = #tpu.dot_dimension_numbers<[1], [0], [0], [1], [0, 0, 1, 1], [], []>} : vector<8x8xf32>, vector<8x256xf32>, vector<8x256xf32> -> vector<8x256xf32>
    %cst_4 = arith.constant 0.000000e+00 : f32
    %4 = vector.broadcast %cst_4 : f32 to vector<8x256xf32>
    %5 = arith.maximumf %3, %4 : vector<8x256xf32>
    %6 = tpu.iota {dimensions = array<i32: 0>} : vector<8x1xi32>
    %c1_i32 = arith.constant 1 : i32
    %7 = vector.broadcast %c1_i32 : i32 to vector<8x1xi32>
    %8 = arith.cmpi sge, %6, %7 : vector<8x1xi32>
    %9 = arith.extui %8 : vector<8x1xi1> to vector<8x1xi32>
    %10 = arith.sitofp %9 : vector<8x1xi32> to vector<8x1xf32>
    %c6_i32 = arith.constant 6 : i32
    %11 = vector.broadcast %c6_i32 : i32 to vector<8x1xi32>
    %12 = arith.cmpi sle, %6, %11 : vector<8x1xi32>
    %13 = arith.extui %12 : vector<8x1xi1> to vector<8x1xi32>
    %14 = arith.sitofp %13 : vector<8x1xi32> to vector<8x1xf32>
    %c17_i32 = arith.constant 17 : i32
    %15 = tpu.dynamic_rotate %5 by %c17_i32 dim 1 : vector<8x256xf32>, i32 -> vector<8x256xf32>
    %c0_5 = arith.constant 0 : index
    %c0_6 = arith.constant 0 : index
    %c0_7 = arith.constant 0 : index
    %16 = vector.load %arg8[%c0_5, %c0_6, %c0_7] : memref<9x1x256xf32, #tpu.memory_space<vmem>>, vector<1x1x256xf32>
    %17 = vector.shape_cast %16 : vector<1x1x256xf32> to vector<1x256xf32>
    %18 = vector.broadcast %17 : vector<1x256xf32> to vector<8x256xf32>
    %19 = arith.mulf %15, %18 : vector<8x256xf32>
    %c0_8 = arith.constant 0 : index
    %c0_9 = arith.constant 0 : index
    %c0_10 = arith.constant 0 : index
    %20 = vector.load %arg4[%c0_8, %c0_9, %c0_10] : memref<9x8x1xf32, #tpu.memory_space<vmem>>, vector<1x8x1xf32>
    %21 = vector.shape_cast %20 : vector<1x8x1xf32> to vector<8x1xf32>
    %22 = vector.broadcast %21 : vector<8x1xf32> to vector<8x256xf32>
    %23 = arith.mulf %19, %22 : vector<8x256xf32>
    %c16_i32 = arith.constant 16 : i32
    %24 = tpu.dynamic_rotate %5 by %c16_i32 dim 1 : vector<8x256xf32>, i32 -> vector<8x256xf32>
    %c1 = arith.constant 1 : index
    %c0_11 = arith.constant 0 : index
    %c0_12 = arith.constant 0 : index
    %25 = vector.load %arg8[%c1, %c0_11, %c0_12] : memref<9x1x256xf32, #tpu.memory_space<vmem>>, vector<1x1x256xf32>
    %26 = vector.shape_cast %25 : vector<1x1x256xf32> to vector<1x256xf32>
    %27 = vector.broadcast %26 : vector<1x256xf32> to vector<8x256xf32>
    %28 = arith.mulf %24, %27 : vector<8x256xf32>
    %c1_13 = arith.constant 1 : index
    %c0_14 = arith.constant 0 : index
    %c0_15 = arith.constant 0 : index
    %29 = vector.load %arg4[%c1_13, %c0_14, %c0_15] : memref<9x8x1xf32, #tpu.memory_space<vmem>>, vector<1x8x1xf32>
    %30 = vector.shape_cast %29 : vector<1x8x1xf32> to vector<8x1xf32>
    %31 = vector.broadcast %30 : vector<8x1xf32> to vector<8x256xf32>
    %32 = arith.mulf %28, %31 : vector<8x256xf32>
    %33 = arith.addf %23, %32 : vector<8x256xf32>
    %c15_i32 = arith.constant 15 : i32
    %34 = tpu.dynamic_rotate %5 by %c15_i32 dim 1 : vector<8x256xf32>, i32 -> vector<8x256xf32>
    %c2 = arith.constant 2 : index
    %c0_16 = arith.constant 0 : index
    %c0_17 = arith.constant 0 : index
    %35 = vector.load %arg8[%c2, %c0_16, %c0_17] : memref<9x1x256xf32, #tpu.memory_space<vmem>>, vector<1x1x256xf32>
    %36 = vector.shape_cast %35 : vector<1x1x256xf32> to vector<1x256xf32>
    %37 = vector.broadcast %36 : vector<1x256xf32> to vector<8x256xf32>
    %38 = arith.mulf %34, %37 : vector<8x256xf32>
    %c2_18 = arith.constant 2 : index
    %c0_19 = arith.constant 0 : index
    %c0_20 = arith.constant 0 : index
    %39 = vector.load %arg4[%c2_18, %c0_19, %c0_20] : memref<9x8x1xf32, #tpu.memory_space<vmem>>, vector<1x8x1xf32>
    %40 = vector.shape_cast %39 : vector<1x8x1xf32> to vector<8x1xf32>
    %41 = vector.broadcast %40 : vector<8x1xf32> to vector<8x256xf32>
    %42 = arith.mulf %38, %41 : vector<8x256xf32>
    %43 = arith.addf %33, %42 : vector<8x256xf32>
    %c1_i32_21 = arith.constant 1 : i32
    %44 = tpu.dynamic_rotate %5 by %c1_i32_21 dim 1 : vector<8x256xf32>, i32 -> vector<8x256xf32>
    %c3 = arith.constant 3 : index
    %c0_22 = arith.constant 0 : index
    %c0_23 = arith.constant 0 : index
    %45 = vector.load %arg8[%c3, %c0_22, %c0_23] : memref<9x1x256xf32, #tpu.memory_space<vmem>>, vector<1x1x256xf32>
    %46 = vector.shape_cast %45 : vector<1x1x256xf32> to vector<1x256xf32>
    %47 = vector.broadcast %46 : vector<1x256xf32> to vector<8x256xf32>
    %48 = arith.mulf %44, %47 : vector<8x256xf32>
    %c3_24 = arith.constant 3 : index
    %c0_25 = arith.constant 0 : index
    %c0_26 = arith.constant 0 : index
    %49 = vector.load %arg4[%c3_24, %c0_25, %c0_26] : memref<9x8x1xf32, #tpu.memory_space<vmem>>, vector<1x8x1xf32>
    %50 = vector.shape_cast %49 : vector<1x8x1xf32> to vector<8x1xf32>
    %51 = vector.broadcast %50 : vector<8x1xf32> to vector<8x256xf32>
    %52 = arith.mulf %48, %51 : vector<8x256xf32>
    %53 = arith.addf %43, %52 : vector<8x256xf32>
    %c4 = arith.constant 4 : index
    %c0_27 = arith.constant 0 : index
    %c0_28 = arith.constant 0 : index
    %54 = vector.load %arg8[%c4, %c0_27, %c0_28] : memref<9x1x256xf32, #tpu.memory_space<vmem>>, vector<1x1x256xf32>
    %55 = vector.shape_cast %54 : vector<1x1x256xf32> to vector<1x256xf32>
    %56 = vector.broadcast %55 : vector<1x256xf32> to vector<8x256xf32>
    %57 = arith.mulf %5, %56 : vector<8x256xf32>
    %c4_29 = arith.constant 4 : index
    %c0_30 = arith.constant 0 : index
    %c0_31 = arith.constant 0 : index
    %58 = vector.load %arg4[%c4_29, %c0_30, %c0_31] : memref<9x8x1xf32, #tpu.memory_space<vmem>>, vector<1x8x1xf32>
    %59 = vector.shape_cast %58 : vector<1x8x1xf32> to vector<8x1xf32>
    %60 = vector.broadcast %59 : vector<8x1xf32> to vector<8x256xf32>
    %61 = arith.mulf %57, %60 : vector<8x256xf32>
    %62 = arith.addf %53, %61 : vector<8x256xf32>
    %c255_i32 = arith.constant 255 : i32
    %63 = tpu.dynamic_rotate %5 by %c255_i32 dim 1 : vector<8x256xf32>, i32 -> vector<8x256xf32>
    %c5 = arith.constant 5 : index
    %c0_32 = arith.constant 0 : index
    %c0_33 = arith.constant 0 : index
    %64 = vector.load %arg8[%c5, %c0_32, %c0_33] : memref<9x1x256xf32, #tpu.memory_space<vmem>>, vector<1x1x256xf32>
    %65 = vector.shape_cast %64 : vector<1x1x256xf32> to vector<1x256xf32>
    %66 = vector.broadcast %65 : vector<1x256xf32> to vector<8x256xf32>
    %67 = arith.mulf %63, %66 : vector<8x256xf32>
    %c5_34 = arith.constant 5 : index
    %c0_35 = arith.constant 0 : index
    %c0_36 = arith.constant 0 : index
    %68 = vector.load %arg4[%c5_34, %c0_35, %c0_36] : memref<9x8x1xf32, #tpu.memory_space<vmem>>, vector<1x8x1xf32>
    %69 = vector.shape_cast %68 : vector<1x8x1xf32> to vector<8x1xf32>
    %70 = vector.broadcast %69 : vector<8x1xf32> to vector<8x256xf32>
    %71 = arith.mulf %67, %70 : vector<8x256xf32>
    %72 = arith.addf %62, %71 : vector<8x256xf32>
    %c241_i32 = arith.constant 241 : i32
    %73 = tpu.dynamic_rotate %5 by %c241_i32 dim 1 : vector<8x256xf32>, i32 -> vector<8x256xf32>
    %c6 = arith.constant 6 : index
    %c0_37 = arith.constant 0 : index
    %c0_38 = arith.constant 0 : index
    %74 = vector.load %arg8[%c6, %c0_37, %c0_38] : memref<9x1x256xf32, #tpu.memory_space<vmem>>, vector<1x1x256xf32>
    %75 = vector.shape_cast %74 : vector<1x1x256xf32> to vector<1x256xf32>
    %76 = vector.broadcast %75 : vector<1x256xf32> to vector<8x256xf32>
    %77 = arith.mulf %73, %76 : vector<8x256xf32>
    %c6_39 = arith.constant 6 : index
    %c0_40 = arith.constant 0 : index
    %c0_41 = arith.constant 0 : index
    %78 = vector.load %arg4[%c6_39, %c0_40, %c0_41] : memref<9x8x1xf32, #tpu.memory_space<vmem>>, vector<1x8x1xf32>
    %79 = vector.shape_cast %78 : vector<1x8x1xf32> to vector<8x1xf32>
    %80 = vector.broadcast %79 : vector<8x1xf32> to vector<8x256xf32>
    %81 = arith.mulf %77, %80 : vector<8x256xf32>
    %82 = arith.addf %72, %81 : vector<8x256xf32>
    %c240_i32 = arith.constant 240 : i32
    %83 = tpu.dynamic_rotate %5 by %c240_i32 dim 1 : vector<8x256xf32>, i32 -> vector<8x256xf32>
    %c7 = arith.constant 7 : index
    %c0_42 = arith.constant 0 : index
    %c0_43 = arith.constant 0 : index
    %84 = vector.load %arg8[%c7, %c0_42, %c0_43] : memref<9x1x256xf32, #tpu.memory_space<vmem>>, vector<1x1x256xf32>
    %85 = vector.shape_cast %84 : vector<1x1x256xf32> to vector<1x256xf32>
    %86 = vector.broadcast %85 : vector<1x256xf32> to vector<8x256xf32>
    %87 = arith.mulf %83, %86 : vector<8x256xf32>
    %c7_44 = arith.constant 7 : index
    %c0_45 = arith.constant 0 : index
    %c0_46 = arith.constant 0 : index
    %88 = vector.load %arg4[%c7_44, %c0_45, %c0_46] : memref<9x8x1xf32, #tpu.memory_space<vmem>>, vector<1x8x1xf32>
    %89 = vector.shape_cast %88 : vector<1x8x1xf32> to vector<8x1xf32>
    %90 = vector.broadcast %89 : vector<8x1xf32> to vector<8x256xf32>
    %91 = arith.mulf %87, %90 : vector<8x256xf32>
    %92 = arith.addf %82, %91 : vector<8x256xf32>
    %c239_i32 = arith.constant 239 : i32
    %93 = tpu.dynamic_rotate %5 by %c239_i32 dim 1 : vector<8x256xf32>, i32 -> vector<8x256xf32>
    %c8 = arith.constant 8 : index
    %c0_47 = arith.constant 0 : index
    %c0_48 = arith.constant 0 : index
    %94 = vector.load %arg8[%c8, %c0_47, %c0_48] : memref<9x1x256xf32, #tpu.memory_space<vmem>>, vector<1x1x256xf32>
    %95 = vector.shape_cast %94 : vector<1x1x256xf32> to vector<1x256xf32>
    %96 = vector.broadcast %95 : vector<1x256xf32> to vector<8x256xf32>
    %97 = arith.mulf %93, %96 : vector<8x256xf32>
    %c8_49 = arith.constant 8 : index
    %c0_50 = arith.constant 0 : index
    %c0_51 = arith.constant 0 : index
    %98 = vector.load %arg4[%c8_49, %c0_50, %c0_51] : memref<9x8x1xf32, #tpu.memory_space<vmem>>, vector<1x8x1xf32>
    %99 = vector.shape_cast %98 : vector<1x8x1xf32> to vector<8x1xf32>
    %100 = vector.broadcast %99 : vector<8x1xf32> to vector<8x256xf32>
    %101 = arith.mulf %97, %100 : vector<8x256xf32>
    %102 = arith.addf %92, %101 : vector<8x256xf32>
    %c0_52 = arith.constant 0 : index
    %c0_53 = arith.constant 0 : index
    %c0_54 = arith.constant 0 : index
    %103 = vector.load %arg7[%c0_52, %c0_53, %c0_54] : memref<3x8x1xf32, #tpu.memory_space<vmem>>, vector<1x8x1xf32>
    %104 = vector.shape_cast %103 : vector<1x8x1xf32> to vector<8x1xf32>
    %cst_55 = arith.constant 0.000000e+00 : f32
    %105 = vector.broadcast %cst_55 : f32 to vector<8x256xf32>
    %106 = arith.maximumf %102, %105 : vector<8x256xf32>
    %107 = vector.broadcast %104 : vector<8x1xf32> to vector<8x256xf32>
    %108 = arith.mulf %107, %106 : vector<8x256xf32>
    %c1_i32_56 = arith.constant 1 : i32
    %109 = tpu.dynamic_rotate %5 by %c1_i32_56 dim 0 : vector<8x256xf32>, i32 -> vector<8x256xf32>
    %110 = vector.broadcast %10 : vector<8x1xf32> to vector<8x256xf32>
    %111 = arith.mulf %109, %110 : vector<8x256xf32>
    %c0_57 = arith.constant 0 : index
    %c0_58 = arith.constant 0 : index
    %c0_59 = arith.constant 0 : index
    %112 = vector.load %arg5[%c0_57, %c0_58, %c0_59] : memref<9x1x256xf32, #tpu.memory_space<vmem>>, vector<1x1x256xf32>
    %113 = vector.shape_cast %112 : vector<1x1x256xf32> to vector<1x256xf32>
    %c1_i32_60 = arith.constant 1 : i32
    %114 = tpu.dynamic_rotate %111 by %c1_i32_60 dim 1 : vector<8x256xf32>, i32 -> vector<8x256xf32>
    %115 = vector.broadcast %113 : vector<1x256xf32> to vector<8x256xf32>
    %116 = arith.mulf %115, %114 : vector<8x256xf32>
    %c1_61 = arith.constant 1 : index
    %c0_62 = arith.constant 0 : index
    %c0_63 = arith.constant 0 : index
    %117 = vector.load %arg5[%c1_61, %c0_62, %c0_63] : memref<9x1x256xf32, #tpu.memory_space<vmem>>, vector<1x1x256xf32>
    %118 = vector.shape_cast %117 : vector<1x1x256xf32> to vector<1x256xf32>
    %119 = vector.broadcast %118 : vector<1x256xf32> to vector<8x256xf32>
    %120 = arith.mulf %119, %111 : vector<8x256xf32>
    %121 = arith.addf %116, %120 : vector<8x256xf32>
    %c2_64 = arith.constant 2 : index
    %c0_65 = arith.constant 0 : index
    %c0_66 = arith.constant 0 : index
    %122 = vector.load %arg5[%c2_64, %c0_65, %c0_66] : memref<9x1x256xf32, #tpu.memory_space<vmem>>, vector<1x1x256xf32>
    %123 = vector.shape_cast %122 : vector<1x1x256xf32> to vector<1x256xf32>
    %c255_i32_67 = arith.constant 255 : i32
    %124 = tpu.dynamic_rotate %111 by %c255_i32_67 dim 1 : vector<8x256xf32>, i32 -> vector<8x256xf32>
    %125 = vector.broadcast %123 : vector<1x256xf32> to vector<8x256xf32>
    %126 = arith.mulf %125, %124 : vector<8x256xf32>
    %127 = arith.addf %121, %126 : vector<8x256xf32>
    %c0_68 = arith.constant 0 : index
    %c0_69 = arith.constant 0 : index
    %c0_70 = arith.constant 0 : index
    %128 = vector.load %arg6[%c0_68, %c0_69, %c0_70] : memref<9x1x256xf32, #tpu.memory_space<vmem>>, vector<1x1x256xf32>
    %129 = vector.shape_cast %128 : vector<1x1x256xf32> to vector<1x256xf32>
    %c16_i32_71 = arith.constant 16 : i32
    %130 = tpu.dynamic_rotate %111 by %c16_i32_71 dim 1 : vector<8x256xf32>, i32 -> vector<8x256xf32>
    %131 = vector.broadcast %129 : vector<1x256xf32> to vector<8x256xf32>
    %132 = arith.mulf %131, %130 : vector<8x256xf32>
    %c3_72 = arith.constant 3 : index
    %c0_73 = arith.constant 0 : index
    %c0_74 = arith.constant 0 : index
    %133 = vector.load %arg6[%c3_72, %c0_73, %c0_74] : memref<9x1x256xf32, #tpu.memory_space<vmem>>, vector<1x1x256xf32>
    %134 = vector.shape_cast %133 : vector<1x1x256xf32> to vector<1x256xf32>
    %135 = vector.broadcast %134 : vector<1x256xf32> to vector<8x256xf32>
    %136 = arith.mulf %135, %111 : vector<8x256xf32>
    %137 = arith.addf %132, %136 : vector<8x256xf32>
    %c6_75 = arith.constant 6 : index
    %c0_76 = arith.constant 0 : index
    %c0_77 = arith.constant 0 : index
    %138 = vector.load %arg6[%c6_75, %c0_76, %c0_77] : memref<9x1x256xf32, #tpu.memory_space<vmem>>, vector<1x1x256xf32>
    %139 = vector.shape_cast %138 : vector<1x1x256xf32> to vector<1x256xf32>
    %c240_i32_78 = arith.constant 240 : i32
    %140 = tpu.dynamic_rotate %111 by %c240_i32_78 dim 1 : vector<8x256xf32>, i32 -> vector<8x256xf32>
    %141 = vector.broadcast %139 : vector<1x256xf32> to vector<8x256xf32>
    %142 = arith.mulf %141, %140 : vector<8x256xf32>
    %143 = arith.addf %137, %142 : vector<8x256xf32>
    %c3_79 = arith.constant 3 : index
    %c0_80 = arith.constant 0 : index
    %c0_81 = arith.constant 0 : index
    %144 = vector.load %arg5[%c3_79, %c0_80, %c0_81] : memref<9x1x256xf32, #tpu.memory_space<vmem>>, vector<1x1x256xf32>
    %145 = vector.shape_cast %144 : vector<1x1x256xf32> to vector<1x256xf32>
    %c1_i32_82 = arith.constant 1 : i32
    %146 = tpu.dynamic_rotate %5 by %c1_i32_82 dim 1 : vector<8x256xf32>, i32 -> vector<8x256xf32>
    %147 = vector.broadcast %145 : vector<1x256xf32> to vector<8x256xf32>
    %148 = arith.mulf %147, %146 : vector<8x256xf32>
    %149 = arith.addf %127, %148 : vector<8x256xf32>
    %c4_83 = arith.constant 4 : index
    %c0_84 = arith.constant 0 : index
    %c0_85 = arith.constant 0 : index
    %150 = vector.load %arg5[%c4_83, %c0_84, %c0_85] : memref<9x1x256xf32, #tpu.memory_space<vmem>>, vector<1x1x256xf32>
    %151 = vector.shape_cast %150 : vector<1x1x256xf32> to vector<1x256xf32>
    %152 = vector.broadcast %151 : vector<1x256xf32> to vector<8x256xf32>
    %153 = arith.mulf %152, %5 : vector<8x256xf32>
    %154 = arith.addf %149, %153 : vector<8x256xf32>
    %c5_86 = arith.constant 5 : index
    %c0_87 = arith.constant 0 : index
    %c0_88 = arith.constant 0 : index
    %155 = vector.load %arg5[%c5_86, %c0_87, %c0_88] : memref<9x1x256xf32, #tpu.memory_space<vmem>>, vector<1x1x256xf32>
    %156 = vector.shape_cast %155 : vector<1x1x256xf32> to vector<1x256xf32>
    %c255_i32_89 = arith.constant 255 : i32
    %157 = tpu.dynamic_rotate %5 by %c255_i32_89 dim 1 : vector<8x256xf32>, i32 -> vector<8x256xf32>
    %158 = vector.broadcast %156 : vector<1x256xf32> to vector<8x256xf32>
    %159 = arith.mulf %158, %157 : vector<8x256xf32>
    %160 = arith.addf %154, %159 : vector<8x256xf32>
    %c1_90 = arith.constant 1 : index
    %c0_91 = arith.constant 0 : index
    %c0_92 = arith.constant 0 : index
    %161 = vector.load %arg6[%c1_90, %c0_91, %c0_92] : memref<9x1x256xf32, #tpu.memory_space<vmem>>, vector<1x1x256xf32>
    %162 = vector.shape_cast %161 : vector<1x1x256xf32> to vector<1x256xf32>
    %c16_i32_93 = arith.constant 16 : i32
    %163 = tpu.dynamic_rotate %5 by %c16_i32_93 dim 1 : vector<8x256xf32>, i32 -> vector<8x256xf32>
    %164 = vector.broadcast %162 : vector<1x256xf32> to vector<8x256xf32>
    %165 = arith.mulf %164, %163 : vector<8x256xf32>
    %166 = arith.addf %143, %165 : vector<8x256xf32>
    %c4_94 = arith.constant 4 : index
    %c0_95 = arith.constant 0 : index
    %c0_96 = arith.constant 0 : index
    %167 = vector.load %arg6[%c4_94, %c0_95, %c0_96] : memref<9x1x256xf32, #tpu.memory_space<vmem>>, vector<1x1x256xf32>
    %168 = vector.shape_cast %167 : vector<1x1x256xf32> to vector<1x256xf32>
    %169 = vector.broadcast %168 : vector<1x256xf32> to vector<8x256xf32>
    %170 = arith.mulf %169, %5 : vector<8x256xf32>
    %171 = arith.addf %166, %170 : vector<8x256xf32>
    %c7_97 = arith.constant 7 : index
    %c0_98 = arith.constant 0 : index
    %c0_99 = arith.constant 0 : index
    %172 = vector.load %arg6[%c7_97, %c0_98, %c0_99] : memref<9x1x256xf32, #tpu.memory_space<vmem>>, vector<1x1x256xf32>
    %173 = vector.shape_cast %172 : vector<1x1x256xf32> to vector<1x256xf32>
    %c240_i32_100 = arith.constant 240 : i32
    %174 = tpu.dynamic_rotate %5 by %c240_i32_100 dim 1 : vector<8x256xf32>, i32 -> vector<8x256xf32>
    %175 = vector.broadcast %173 : vector<1x256xf32> to vector<8x256xf32>
    %176 = arith.mulf %175, %174 : vector<8x256xf32>
    %177 = arith.addf %171, %176 : vector<8x256xf32>
    %c7_i32 = arith.constant 7 : i32
    %178 = tpu.dynamic_rotate %5 by %c7_i32 dim 0 : vector<8x256xf32>, i32 -> vector<8x256xf32>
    %179 = vector.broadcast %14 : vector<8x1xf32> to vector<8x256xf32>
    %180 = arith.mulf %178, %179 : vector<8x256xf32>
    %c6_101 = arith.constant 6 : index
    %c0_102 = arith.constant 0 : index
    %c0_103 = arith.constant 0 : index
    %181 = vector.load %arg5[%c6_101, %c0_102, %c0_103] : memref<9x1x256xf32, #tpu.memory_space<vmem>>, vector<1x1x256xf32>
    %182 = vector.shape_cast %181 : vector<1x1x256xf32> to vector<1x256xf32>
    %c1_i32_104 = arith.constant 1 : i32
    %183 = tpu.dynamic_rotate %180 by %c1_i32_104 dim 1 : vector<8x256xf32>, i32 -> vector<8x256xf32>
    %184 = vector.broadcast %182 : vector<1x256xf32> to vector<8x256xf32>
    %185 = arith.mulf %184, %183 : vector<8x256xf32>
    %186 = arith.addf %160, %185 : vector<8x256xf32>
    %c7_105 = arith.constant 7 : index
    %c0_106 = arith.constant 0 : index
    %c0_107 = arith.constant 0 : index
    %187 = vector.load %arg5[%c7_105, %c0_106, %c0_107] : memref<9x1x256xf32, #tpu.memory_space<vmem>>, vector<1x1x256xf32>
    %188 = vector.shape_cast %187 : vector<1x1x256xf32> to vector<1x256xf32>
    %189 = vector.broadcast %188 : vector<1x256xf32> to vector<8x256xf32>
    %190 = arith.mulf %189, %180 : vector<8x256xf32>
    %191 = arith.addf %186, %190 : vector<8x256xf32>
    %c8_108 = arith.constant 8 : index
    %c0_109 = arith.constant 0 : index
    %c0_110 = arith.constant 0 : index
    %192 = vector.load %arg5[%c8_108, %c0_109, %c0_110] : memref<9x1x256xf32, #tpu.memory_space<vmem>>, vector<1x1x256xf32>
    %193 = vector.shape_cast %192 : vector<1x1x256xf32> to vector<1x256xf32>
    %c255_i32_111 = arith.constant 255 : i32
    %194 = tpu.dynamic_rotate %180 by %c255_i32_111 dim 1 : vector<8x256xf32>, i32 -> vector<8x256xf32>
    %195 = vector.broadcast %193 : vector<1x256xf32> to vector<8x256xf32>
    %196 = arith.mulf %195, %194 : vector<8x256xf32>
    %197 = arith.addf %191, %196 : vector<8x256xf32>
    %c2_112 = arith.constant 2 : index
    %c0_113 = arith.constant 0 : index
    %c0_114 = arith.constant 0 : index
    %198 = vector.load %arg6[%c2_112, %c0_113, %c0_114] : memref<9x1x256xf32, #tpu.memory_space<vmem>>, vector<1x1x256xf32>
    %199 = vector.shape_cast %198 : vector<1x1x256xf32> to vector<1x256xf32>
    %c16_i32_115 = arith.constant 16 : i32
    %200 = tpu.dynamic_rotate %180 by %c16_i32_115 dim 1 : vector<8x256xf32>, i32 -> vector<8x256xf32>
    %201 = vector.broadcast %199 : vector<1x256xf32> to vector<8x256xf32>
    %202 = arith.mulf %201, %200 : vector<8x256xf32>
    %203 = arith.addf %177, %202 : vector<8x256xf32>
    %c5_116 = arith.constant 5 : index
    %c0_117 = arith.constant 0 : index
    %c0_118 = arith.constant 0 : index
    %204 = vector.load %arg6[%c5_116, %c0_117, %c0_118] : memref<9x1x256xf32, #tpu.memory_space<vmem>>, vector<1x1x256xf32>
    %205 = vector.shape_cast %204 : vector<1x1x256xf32> to vector<1x256xf32>
    %206 = vector.broadcast %205 : vector<1x256xf32> to vector<8x256xf32>
    %207 = arith.mulf %206, %180 : vector<8x256xf32>
    %208 = arith.addf %203, %207 : vector<8x256xf32>
    %c8_119 = arith.constant 8 : index
    %c0_120 = arith.constant 0 : index
    %c0_121 = arith.constant 0 : index
    %209 = vector.load %arg6[%c8_119, %c0_120, %c0_121] : memref<9x1x256xf32, #tpu.memory_space<vmem>>, vector<1x1x256xf32>
    %210 = vector.shape_cast %209 : vector<1x1x256xf32> to vector<1x256xf32>
    %c240_i32_122 = arith.constant 240 : i32
    %211 = tpu.dynamic_rotate %180 by %c240_i32_122 dim 1 : vector<8x256xf32>, i32 -> vector<8x256xf32>
    %212 = vector.broadcast %210 : vector<1x256xf32> to vector<8x256xf32>
    %213 = arith.mulf %212, %211 : vector<8x256xf32>
    %214 = arith.addf %208, %213 : vector<8x256xf32>
    %c1_123 = arith.constant 1 : index
    %c0_124 = arith.constant 0 : index
    %c0_125 = arith.constant 0 : index
    %215 = vector.load %arg7[%c1_123, %c0_124, %c0_125] : memref<3x8x1xf32, #tpu.memory_space<vmem>>, vector<1x8x1xf32>
    %216 = vector.shape_cast %215 : vector<1x8x1xf32> to vector<8x1xf32>
    %cst_126 = arith.constant 0.000000e+00 : f32
    %217 = vector.broadcast %cst_126 : f32 to vector<8x256xf32>
    %218 = arith.maximumf %197, %217 : vector<8x256xf32>
    %219 = vector.broadcast %216 : vector<8x1xf32> to vector<8x256xf32>
    %220 = arith.mulf %219, %218 : vector<8x256xf32>
    %221 = arith.addf %108, %220 : vector<8x256xf32>
    %c2_127 = arith.constant 2 : index
    %c0_128 = arith.constant 0 : index
    %c0_129 = arith.constant 0 : index
    %222 = vector.load %arg7[%c2_127, %c0_128, %c0_129] : memref<3x8x1xf32, #tpu.memory_space<vmem>>, vector<1x8x1xf32>
    %223 = vector.shape_cast %222 : vector<1x8x1xf32> to vector<8x1xf32>
    %cst_130 = arith.constant 0.000000e+00 : f32
    %224 = vector.broadcast %cst_130 : f32 to vector<8x256xf32>
    %225 = arith.maximumf %214, %224 : vector<8x256xf32>
    %226 = vector.broadcast %223 : vector<8x1xf32> to vector<8x256xf32>
    %227 = arith.mulf %226, %225 : vector<8x256xf32>
    %228 = arith.addf %221, %227 : vector<8x256xf32>
    %cst_131 = arith.constant 0.000000e+00 : f32
    %229 = vector.broadcast %cst_131 : f32 to vector<8x256xf32>
    %230 = arith.maximumf %228, %229 : vector<8x256xf32>
    %c0_132 = arith.constant 0 : index
    %c0_133 = arith.constant 0 : index
    %231 = vector.load %arg12[%c0_132, %c0_133] : memref<256x1xf32, #tpu.memory_space<vmem>>, vector<256x1xf32>
    %cst_134 = arith.constant dense<0.000000e+00> : vector<8x1xf32>
    %232 = tpu.matmul %230, %231, %cst_134 {dimension_numbers = #tpu.dot_dimension_numbers<[1], [0], [0], [1], [0, 0, 1, 1], [], []>} : vector<8x256xf32>, vector<256x1xf32>, vector<8x1xf32> -> vector<8x1xf32>
    %c0_135 = arith.constant 0 : index
    %c0_136 = arith.constant 0 : index
    %233 = vector.load %arg9[%c0_135, %c0_136] : memref<2x8xf32, #tpu.memory_space<vmem>>, vector<2x8xf32>
    %cst_137 = arith.constant dense<0.000000e+00> : vector<2x1xf32>
    %234 = tpu.matmul %233, %232, %cst_137 {dimension_numbers = #tpu.dot_dimension_numbers<[1], [0], [0], [1], [0, 0, 1, 1], [], []>} : vector<2x8xf32>, vector<8x1xf32>, vector<2x1xf32> -> vector<2x1xf32>
    %cst_138 = arith.constant 0.000000e+00 : f32
    %235 = vector.broadcast %cst_138 : f32 to vector<2x1xf32>
    %236 = arith.maximumf %234, %235 : vector<2x1xf32>
    %c0_139 = arith.constant 0 : index
    %c0_140 = arith.constant 0 : index
    %237 = vector.load %arg10[%c0_139, %c0_140] : memref<8x2xf32, #tpu.memory_space<vmem>>, vector<8x2xf32>
    %cst_141 = arith.constant dense<0.000000e+00> : vector<8x1xf32>
    %238 = tpu.matmul %237, %236, %cst_141 {dimension_numbers = #tpu.dot_dimension_numbers<[1], [0], [0], [1], [0, 0, 1, 1], [], []>} : vector<8x2xf32>, vector<2x1xf32>, vector<8x1xf32> -> vector<8x1xf32>
    %cst_142 = arith.constant 0.000000e+00 : f32
    %239 = vector.broadcast %cst_142 : f32 to vector<8x1xf32>
    %240 = arith.subf %239, %238 : vector<8x1xf32>
    %241 = math.exp %240 : vector<8x1xf32>
    %cst_143 = arith.constant 1.000000e+00 : f32
    %242 = vector.broadcast %cst_143 : f32 to vector<8x1xf32>
    %243 = arith.addf %242, %241 : vector<8x1xf32>
    %cst_144 = arith.constant 1.000000e+00 : f32
    %244 = vector.broadcast %cst_144 : f32 to vector<8x1xf32>
    %245 = arith.divf %244, %243 : vector<8x1xf32>
    %c17_i32_145 = arith.constant 17 : i32
    %246 = tpu.dynamic_rotate %230 by %c17_i32_145 dim 1 : vector<8x256xf32>, i32 -> vector<8x256xf32>
    %c0_146 = arith.constant 0 : index
    %c0_147 = arith.constant 0 : index
    %c0_148 = arith.constant 0 : index
    %247 = vector.load %arg8[%c0_146, %c0_147, %c0_148] : memref<9x1x256xf32, #tpu.memory_space<vmem>>, vector<1x1x256xf32>
    %248 = vector.shape_cast %247 : vector<1x1x256xf32> to vector<1x256xf32>
    %249 = vector.broadcast %248 : vector<1x256xf32> to vector<8x256xf32>
    %250 = arith.mulf %246, %249 : vector<8x256xf32>
    %c16_i32_149 = arith.constant 16 : i32
    %251 = tpu.dynamic_rotate %230 by %c16_i32_149 dim 1 : vector<8x256xf32>, i32 -> vector<8x256xf32>
    %c1_150 = arith.constant 1 : index
    %c0_151 = arith.constant 0 : index
    %c0_152 = arith.constant 0 : index
    %252 = vector.load %arg8[%c1_150, %c0_151, %c0_152] : memref<9x1x256xf32, #tpu.memory_space<vmem>>, vector<1x1x256xf32>
    %253 = vector.shape_cast %252 : vector<1x1x256xf32> to vector<1x256xf32>
    %254 = vector.broadcast %253 : vector<1x256xf32> to vector<8x256xf32>
    %255 = arith.mulf %251, %254 : vector<8x256xf32>
    %c15_i32_153 = arith.constant 15 : i32
    %256 = tpu.dynamic_rotate %230 by %c15_i32_153 dim 1 : vector<8x256xf32>, i32 -> vector<8x256xf32>
    %c2_154 = arith.constant 2 : index
    %c0_155 = arith.constant 0 : index
    %c0_156 = arith.constant 0 : index
    %257 = vector.load %arg8[%c2_154, %c0_155, %c0_156] : memref<9x1x256xf32, #tpu.memory_space<vmem>>, vector<1x1x256xf32>
    %258 = vector.shape_cast %257 : vector<1x1x256xf32> to vector<1x256xf32>
    %259 = vector.broadcast %258 : vector<1x256xf32> to vector<8x256xf32>
    %260 = arith.mulf %256, %259 : vector<8x256xf32>
    %c1_i32_157 = arith.constant 1 : i32
    %261 = tpu.dynamic_rotate %230 by %c1_i32_157 dim 1 : vector<8x256xf32>, i32 -> vector<8x256xf32>
    %c3_158 = arith.constant 3 : index
    %c0_159 = arith.constant 0 : index
    %c0_160 = arith.constant 0 : index
    %262 = vector.load %arg8[%c3_158, %c0_159, %c0_160] : memref<9x1x256xf32, #tpu.memory_space<vmem>>, vector<1x1x256xf32>
    %263 = vector.shape_cast %262 : vector<1x1x256xf32> to vector<1x256xf32>
    %264 = vector.broadcast %263 : vector<1x256xf32> to vector<8x256xf32>
    %265 = arith.mulf %261, %264 : vector<8x256xf32>
    %c4_161 = arith.constant 4 : index
    %c0_162 = arith.constant 0 : index
    %c0_163 = arith.constant 0 : index
    %266 = vector.load %arg8[%c4_161, %c0_162, %c0_163] : memref<9x1x256xf32, #tpu.memory_space<vmem>>, vector<1x1x256xf32>
    %267 = vector.shape_cast %266 : vector<1x1x256xf32> to vector<1x256xf32>
    %268 = vector.broadcast %267 : vector<1x256xf32> to vector<8x256xf32>
    %269 = arith.mulf %230, %268 : vector<8x256xf32>
    %c255_i32_164 = arith.constant 255 : i32
    %270 = tpu.dynamic_rotate %230 by %c255_i32_164 dim 1 : vector<8x256xf32>, i32 -> vector<8x256xf32>
    %c5_165 = arith.constant 5 : index
    %c0_166 = arith.constant 0 : index
    %c0_167 = arith.constant 0 : index
    %271 = vector.load %arg8[%c5_165, %c0_166, %c0_167] : memref<9x1x256xf32, #tpu.memory_space<vmem>>, vector<1x1x256xf32>
    %272 = vector.shape_cast %271 : vector<1x1x256xf32> to vector<1x256xf32>
    %273 = vector.broadcast %272 : vector<1x256xf32> to vector<8x256xf32>
    %274 = arith.mulf %270, %273 : vector<8x256xf32>
    %c241_i32_168 = arith.constant 241 : i32
    %275 = tpu.dynamic_rotate %230 by %c241_i32_168 dim 1 : vector<8x256xf32>, i32 -> vector<8x256xf32>
    %c6_169 = arith.constant 6 : index
    %c0_170 = arith.constant 0 : index
    %c0_171 = arith.constant 0 : index
    %276 = vector.load %arg8[%c6_169, %c0_170, %c0_171] : memref<9x1x256xf32, #tpu.memory_space<vmem>>, vector<1x1x256xf32>
    %277 = vector.shape_cast %276 : vector<1x1x256xf32> to vector<1x256xf32>
    %278 = vector.broadcast %277 : vector<1x256xf32> to vector<8x256xf32>
    %279 = arith.mulf %275, %278 : vector<8x256xf32>
    %c240_i32_172 = arith.constant 240 : i32
    %280 = tpu.dynamic_rotate %230 by %c240_i32_172 dim 1 : vector<8x256xf32>, i32 -> vector<8x256xf32>
    %c7_173 = arith.constant 7 : index
    %c0_174 = arith.constant 0 : index
    %c0_175 = arith.constant 0 : index
    %281 = vector.load %arg8[%c7_173, %c0_174, %c0_175] : memref<9x1x256xf32, #tpu.memory_space<vmem>>, vector<1x1x256xf32>
    %282 = vector.shape_cast %281 : vector<1x1x256xf32> to vector<1x256xf32>
    %283 = vector.broadcast %282 : vector<1x256xf32> to vector<8x256xf32>
    %284 = arith.mulf %280, %283 : vector<8x256xf32>
    %c239_i32_176 = arith.constant 239 : i32
    %285 = tpu.dynamic_rotate %230 by %c239_i32_176 dim 1 : vector<8x256xf32>, i32 -> vector<8x256xf32>
    %c8_177 = arith.constant 8 : index
    %c0_178 = arith.constant 0 : index
    %c0_179 = arith.constant 0 : index
    %286 = vector.load %arg8[%c8_177, %c0_178, %c0_179] : memref<9x1x256xf32, #tpu.memory_space<vmem>>, vector<1x1x256xf32>
    %287 = vector.shape_cast %286 : vector<1x1x256xf32> to vector<1x256xf32>
    %288 = vector.broadcast %287 : vector<1x256xf32> to vector<8x256xf32>
    %289 = arith.mulf %285, %288 : vector<8x256xf32>
    %290 = tpu.concatenate %250, %255, %260, %265, %269, %274, %279, %284, %289 in 0 : vector<8x256xf32>, vector<8x256xf32>, vector<8x256xf32>, vector<8x256xf32>, vector<8x256xf32>, vector<8x256xf32>, vector<8x256xf32>, vector<8x256xf32>, vector<8x256xf32> -> vector<72x256xf32>
    %c0_180 = arith.constant 0 : index
    %c0_181 = arith.constant 0 : index
    %291 = vector.load %arg11[%c0_180, %c0_181] : memref<8x72xf32, #tpu.memory_space<vmem>>, vector<8x72xf32>
    %cst_182 = arith.constant dense<0.000000e+00> : vector<8x256xf32>
    %292 = tpu.matmul %291, %290, %cst_182 {dimension_numbers = #tpu.dot_dimension_numbers<[1], [0], [0], [1], [0, 0, 1, 1], [], []>} : vector<8x72xf32>, vector<72x256xf32>, vector<8x256xf32> -> vector<8x256xf32>
    %cst_183 = arith.constant 0.000000e+00 : f32
    %293 = vector.broadcast %cst_183 : f32 to vector<8x256xf32>
    %294 = arith.maximumf %292, %293 : vector<8x256xf32>
    %295 = vector.broadcast %245 : vector<8x1xf32> to vector<8x256xf32>
    %296 = arith.mulf %294, %295 : vector<8x256xf32>
    %c0_184 = arith.constant 0 : index
    %c0_185 = arith.constant 0 : index
    %297 = vector.load %arg3[%c0_184, %c0_185] : memref<8x8xf32, #tpu.memory_space<vmem>>, vector<8x8xf32>
    %cst_186 = arith.constant dense<0.000000e+00> : vector<8x256xf32>
    %298 = tpu.matmul %297, %5, %cst_186 {dimension_numbers = #tpu.dot_dimension_numbers<[1], [0], [0], [1], [0, 0, 1, 1], [], []>} : vector<8x8xf32>, vector<8x256xf32>, vector<8x256xf32> -> vector<8x256xf32>
    %cst_187 = arith.constant 0.000000e+00 : f32
    %299 = vector.broadcast %cst_187 : f32 to vector<8x256xf32>
    %300 = arith.maximumf %298, %299 : vector<8x256xf32>
    %301 = tpu.concatenate %300, %296 in 0 : vector<8x256xf32>, vector<8x256xf32> -> vector<16x256xf32>
    %c0_188 = arith.constant 0 : index
    %c0_189 = arith.constant 0 : index
    %c0_190 = arith.constant 0 : index
    %302 = vector.load %arg14[%c0_188, %c0_189, %c0_190] : memref<1x16x256xf32, #tpu.memory_space<vmem>>, vector<1x16x256xf32>
    %303 = vector.shape_cast %302 : vector<1x16x256xf32> to vector<16x256xf32>
    %304 = vector.shape_cast %301 : vector<16x256xf32> to vector<1x16x256xf32>
    tpu.vector_store %arg14[%c0_188, %c0_189, %c0_190], %304 {strides = array<i32>} : memref<1x16x256xf32, #tpu.memory_space<vmem>>, vector<1x16x256xf32>,
    return
  }
  func.func @transform_0(%arg0: i32) -> (i32, i32, i32) {
    %c0_i32 = arith.constant 0 : i32
    %c0_i32_0 = arith.constant 0 : i32
    %c0_i32_1 = arith.constant 0 : i32
    return %arg0, %c0_i32, %c0_i32_0 : i32, i32, i32
  }
  func.func @transform_1(%arg0: i32) -> (i32, i32) {
    %c0_i32 = arith.constant 0 : i32
    %c0_i32_0 = arith.constant 0 : i32
    %c0_i32_1 = arith.constant 0 : i32
    return %c0_i32, %c0_i32_0 : i32, i32
  }
  func.func @transform_2(%arg0: i32) -> (i32, i32) {
    %c0_i32 = arith.constant 0 : i32
    %c0_i32_0 = arith.constant 0 : i32
    %c0_i32_1 = arith.constant 0 : i32
    return %c0_i32, %c0_i32_0 : i32, i32
  }
  func.func @transform_3(%arg0: i32) -> (i32, i32, i32) {
    %c0_i32 = arith.constant 0 : i32
    %c0_i32_0 = arith.constant 0 : i32
    %c0_i32_1 = arith.constant 0 : i32
    %c0_i32_2 = arith.constant 0 : i32
    return %c0_i32, %c0_i32_0, %c0_i32_1 : i32, i32, i32
  }
  func.func @transform_4(%arg0: i32) -> (i32, i32, i32) {
    %c0_i32 = arith.constant 0 : i32
    %c0_i32_0 = arith.constant 0 : i32
    %c0_i32_1 = arith.constant 0 : i32
    %c0_i32_2 = arith.constant 0 : i32
    return %c0_i32, %c0_i32_0, %c0_i32_1 : i32, i32, i32
  }
  func.func @transform_5(%arg0: i32) -> (i32, i32, i32) {
    %c0_i32 = arith.constant 0 : i32
    %c0_i32_0 = arith.constant 0 : i32
    %c0_i32_1 = arith.constant 0 : i32
    %c0_i32_2 = arith.constant 0 : i32
    return %c0_i32, %c0_i32_0, %c0_i32_1 : i32, i32, i32
  }
  func.func @transform_6(%arg0: i32) -> (i32, i32, i32) {
    %c0_i32 = arith.constant 0 : i32
    %c0_i32_0 = arith.constant 0 : i32
    %c0_i32_1 = arith.constant 0 : i32
    %c0_i32_2 = arith.constant 0 : i32
    return %c0_i32, %c0_i32_0, %c0_i32_1 : i32, i32, i32
  }
  func.func @transform_7(%arg0: i32) -> (i32, i32, i32) {
    %c0_i32 = arith.constant 0 : i32
    %c0_i32_0 = arith.constant 0 : i32
    %c0_i32_1 = arith.constant 0 : i32
    %c0_i32_2 = arith.constant 0 : i32
    return %c0_i32, %c0_i32_0, %c0_i32_1 : i32, i32, i32
  }
  func.func @transform_8(%arg0: i32) -> (i32, i32) {
    %c0_i32 = arith.constant 0 : i32
    %c0_i32_0 = arith.constant 0 : i32
    %c0_i32_1 = arith.constant 0 : i32
    return %c0_i32, %c0_i32_0 : i32, i32
  }
  func.func @transform_9(%arg0: i32) -> (i32, i32) {
    %c0_i32 = arith.constant 0 : i32
    %c0_i32_0 = arith.constant 0 : i32
    %c0_i32_1 = arith.constant 0 : i32
    return %c0_i32, %c0_i32_0 : i32, i32
  }
  func.func @transform_10(%arg0: i32) -> (i32, i32) {
    %c0_i32 = arith.constant 0 : i32
    %c0_i32_0 = arith.constant 0 : i32
    %c0_i32_1 = arith.constant 0 : i32
    return %c0_i32, %c0_i32_0 : i32, i32
  }
  func.func @transform_11(%arg0: i32) -> (i32, i32) {
    %c0_i32 = arith.constant 0 : i32
    %c0_i32_0 = arith.constant 0 : i32
    %c0_i32_1 = arith.constant 0 : i32
    return %c0_i32, %c0_i32_0 : i32, i32
  }
  func.func @transform_12(%arg0: i32) -> (i32, i32) {
    %c0_i32 = arith.constant 0 : i32
    %c0_i32_0 = arith.constant 0 : i32
    %c0_i32_1 = arith.constant 0 : i32
    return %c0_i32, %c0_i32_0 : i32, i32
  }
  func.func @transform_13(%arg0: i32) -> (i32, i32, i32) {
    %c0_i32 = arith.constant 0 : i32
    %c0_i32_0 = arith.constant 0 : i32
    %c0_i32_1 = arith.constant 0 : i32
    return %arg0, %c0_i32, %c0_i32_0 : i32, i32, i32
  }
}

</mosaic_0001>

<bundles_post_ra>
// kernel: fire_forward.1
= control target key start
LH: loop header
LB: loop body
LE: loop exit
PB: predicated region body
PF: predicated region fallthrough
CT: control target
= control target key end

     0   :  { %s2026_s25 = smov 0   ;;  %s2777_s0 = inlined_call_operand.vmem [shape: f32[2,8,256], index: 0, kind: input, shape index: {}]   ;;  %s2778_s1 = inlined_call_operand.vmem [shape: f32[8,8], index: 1, kind: input, shape index: {}]   ;;  %s2779_s2 = inlined_call_operand.vmem [shape: f32[8,8], index: 2, kind: input, shape index: {}]   ;;  %s2780_s3 = inlined_call_operand.vmem [shape: f32[9,8,1], index: 3, kind: input, shape index: {}]   ;;  %s2781_s4 = inlined_call_operand.vmem [shape: f32[9,1,256], index: 4, kind: input, shape index: {}]   ;;  %s2782_s5 = inlined_call_operand.vmem [shape: f32[9,1,256], index: 5, kind: input, shape index: {}]   ;;  %s2783_s6 = inlined_call_operand.vmem [shape: f32[3,8,1], index: 6, kind: input, shape index: {}]   ;;  %s2784_s7 = inlined_call_operand.vmem [shape: f32[9,1,256], index: 7, kind: input, shape index: {}]   ;;  %s2785_s8 = inlined_call_operand.vmem [shape: f32[2,8], index: 8, kind: input, shape index: {}]   ;;  %s2786_s9 = inlined_call_operand.vmem [shape: f32[8,2], index: 9, kind: input, shape index: {}]   ;;  %s2787_s10 = inlined_call_operand.vmem [shape: f32[8,72], index: 10, kind: input, shape index: {}]   ;;  %s2788_s11 = inlined_call_operand.vmem [shape: f32[256,1], index: 11, kind: input, shape index: {}]   ;;  %s2789_s12 = inlined_call_operand.vmem [shape: f32[1,256], index: 12, kind: input, shape index: {}]   ;;  %s2790_s13 = inlined_call_operand.vmem [shape: f32[2,16,256], index: 13, kind: output, shape index: {}]  }
   0x1 LB: > { %s1760_s26 = sadd.s32 4294967295, %s1943_s25   ;;  %p1764_p0 = scmp.ge.s32.totalorder %s1943_s25, 1  ;;  %s1943_s25 = sphi %s2026_s25, %s23_s25  }
   0x2   : > { %p387_p1 = scmp.lt.s32.totalorder %s1943_s25, 3 }
   0x4   : > { %p388_p2 = pnand %p1764_p0, %p387_p1 }
   0x6   : > { %391 = sbr.rel (%p388_p2) target bundleno = 1246 (0x4de), region = 72 }
   0xd   : > { %p431_p3 = scmp.lt.s32.totalorder %s1760_s26, 1  ;;  %v552_v0 = vld [vmem:[%s2780_s3] sm:$0xff]  ;;  %v2795_v1 = vmov 0.0   ;;  %v1946_v2 = vmov 0   ;;  %v1775_v3 = vld [vmem:[%s2780_s3 + $0x10] sm:$0xff]  ;;  %v1773_v4 = vld [vmem:[%s2780_s3 + $0x8] sm:$0xff]  ;;  %v521_v14 = vlaneseq }
   0xe   : > { %512 = vmatprep.mubr.f32.mxu0 %v2795_v1  ;;  %1931 = vset.pattern.permute.xlu0 %v1946_v2  ;;  %v1777_v5 = vld [vmem:[%s2780_s3 + $0x18] sm:$0xff]  ;;  %v443_v8 = vld [vmem:[%s2778_s1] sm:$0xff]  ;;  %vm444_vm0 = vcmask 64512   ;;  %v1781_v10 = vld [vmem:[%s2780_s3 + $0x28] sm:$0xff]  ;;  %s1947_s23 = smov 15   ;;  %s1948_s24 = smov 17  }
   0xf   : > { %s2813_s26 = smov (!%p431_p3, %s1760_s26), 1  ;;  %555 = vperm.xlu0 %1931, %v552_v0   ;;  %1932 = vset.pattern.permute.xlu1 %v1946_v2  ;;  %v1779_v9 = vld [vmem:[%s2780_s3 + $0x20] sm:$0xff]  ;;  %v1783_v11 = vld [vmem:[%s2780_s3 + $0x30] sm:$0xff]  ;;  %v1785_v12 = vld [vmem:[%s2780_s3 + $0x38] sm:$0xff]  ;;  %v522_v15 = vshrl.u32 %v521_v14, 7  ;;  %s2793_s28 = smov 113  }
  0x10   : > { %619 = vperm.xlu1 %1932, %v1775_v3   ;;  %s1813_s15 = sshll.u32 %s2813_s26, 4  ;;  %v1787_v13 = vld [vmem:[%s2780_s3 + $0x40] sm:$0xff]  ;;  %v1799_v26 = vld [vmem:[%s2781_s4 + $0xe] sm:$0x3]  ;;  %v1802_v31 = vld [vmem:[%s2782_s5 + $0xa] sm:$0x3] }
  0x11   : > { %s435_s20 = scalar_lea.vmem %s2777_s0, %s1813_s15  ;;  %vm523_vm1 = vcmp.ge.s32.totalorder %v522_v15, 1  ;;  %vm526_vm2 = vcmp.le.s32.totalorder %v522_v15, 6  ;;  %v1788_v17 = vld [vmem:[%s2781_s4 + $0x2] sm:$0x3]  ;;  %v1790_v18 = vld [vmem:[%s2782_s5 + $0x6] sm:$0x3] }
  0x12   : > { %v442_v6 = vld [vmem:[%s435_s20 + $0x8] sm:$0xff]  ;;  %v441_v7 = vld [vmem:[%s435_s20] sm:$0xff]  ;;  %v2082_v21 = vsub.s32 0, %v522_v15  ;;  %v2086_v23 = vsub.s32 1, %v522_v15  ;;  %v1770_v24 = vsel %vm523_vm1, 1.0, %v2795_v1  ;;  %v1771_v25 = vsel %vm526_vm2, 1.0, %v2795_v1 }
  0x13   : > { %586 = vperm.xlu0 %1931, %v1773_v4   ;;  %448 = vmatprep.subr.mxu0 %v442_v6  ;;  %s1950_s29 = smov 16   ;;  %s1951_s30 = smov 1   ;;  %v1804_v52 = vld [vmem:[%s2783_s6 + $0x8] sm:$0xff]  ;;  %v1227_v53 = vld [vmem:[%s2788_s11 + $0x80] sm:$0xff]  ;;  %v1229_v59 = vld [vmem:[%s2788_s11 + $0x90] sm:$0xff]  ;;  %vm1955_vm11 = vmmov 0  }
  0x14   : > { %652 = vperm.xlu1 %1932, %v1777_v5   ;;  %449 = vmatpush1.msra.mxu0 %v441_v7  ;;  %v857_v29 = vrot.slane %v1788_v17, %v2082_v21  ;;  %v917_v30 = vrot.slane %v1790_v18, %v2082_v21  ;;  %v861_v34 = vrot.slane %v1788_v17, %v2086_v23  ;;  %s1952_s14 = smov 127   ;;  %s1953_s15 = smov 112   ;;  %v1228_v54 = vld [vmem:[%s2788_s11 + $0x88] sm:$0xff]  ;;  %v1211_v56 = vld [vmem:[%s2788_s11] sm:$0xff]  ;;  %v1230_v60 = vld [vmem:[%s2788_s11 + $0x98] sm:$0xff]  ;;  %vm1393_vm12 = vcmask 1041408  }
  0x15   : > { %1769 = vmatmul.mubr.msk.f32.vlgmr.msra.gmra.mrb[0].mxu0 %vm444_vm0, %v443_v8  ;;  %1854 = vmatprep.subr.mxu0 %v2795_v1  ;;  %v921_v35 = vrot.slane %v1790_v18, %v2086_v23  ;;  %v1086_v38 = vrot.slane %v1799_v26, %v2082_v21  ;;  %v1149_v40 = vrot.slane %v1802_v31, %v2082_v21  ;;  %s2791_s16 = smov 111   ;;  %v1212_v57 = vld [vmem:[%s2788_s11 + $0x8] sm:$0xff]  ;;  %v1213_v62 = vld [vmem:[%s2788_s11 + $0x10] sm:$0xff]  ;;  %v1214_v63 = vld [vmem:[%s2788_s11 + $0x18] sm:$0xff]  ;;  %vm1389_vm13 = vcmask 15360   ;;  %s1814_s17 = sshll.u32 %s2813_s26, 5 }
  0x16   : > { %v1090_v42 = vrot.slane %v1799_v26, %v2086_v23  ;;  %v1153_v43 = vrot.slane %v1802_v31, %v2086_v23  ;;  %v1864_v55 = vpack.c.bf16 %v1228_v54, %v1227_v53  ;;  %v1866_v58 = vpack.c.bf16 %v1212_v57, %v1211_v56  ;;  %v817_v2 = vld [vmem:[%s2783_s6] sm:$0xff]  ;;  %v1232_v4 = vld [vmem:[%s2788_s11 + $0xa8] sm:$0xff]  ;;  %v1805_v15 = vld [vmem:[%s2783_s6 + $0x10] sm:$0xff]  ;;  %s440_s20 = scalar_lea.vmem %s2790_s13, %s1814_s17 }
  0x17   : > { %678 = vperm.xlu0 %1931, %v1779_v9   ;;  %v1868_v61 = vpack.c.bf16 %v1230_v60, %v1229_v59  ;;  %v1870_v0 = vpack.c.bf16 %v1214_v63, %v1213_v62  ;;  %v1231_v3 = vld [vmem:[%s2788_s11 + $0xa0] sm:$0xff]  ;;  %v1216_v7 = vld [vmem:[%s2788_s11 + $0x28] sm:$0xff]  ;;  %v1233_v9 = vld [vmem:[%s2788_s11 + $0xb0] sm:$0xff]  ;;  %vm1540_vm14 = vcmask 588800  }
  0x18   : > { %711 = vperm.xlu1 %1932, %v1781_v10   ;;  %1865 = vmatprep.subr.bf16.mxu1 %v1864_v55  ;;  %v1872_v5 = vpack.c.bf16 %v1232_v4, %v1231_v3  ;;  %v1215_v6 = vld [vmem:[%s2788_s11 + $0x20] sm:$0xff]  ;;  %v1234_v10 = vld [vmem:[%s2788_s11 + $0xb8] sm:$0xff]  ;;  %v1236_v18 = vld [vmem:[%s2788_s11 + $0xc8] sm:$0xff] }
  0x19   : > { %1867 = vmatpush3.bf16.msra.mxu1 %v1866_v58  ;;  %v1874_v8 = vpack.c.bf16 %v1216_v7, %v1215_v6  ;;  %v1235_v17 = vld [vmem:[%s2788_s11 + $0xc0] sm:$0xff]  ;;  %v1222_v31 = vld [vmem:[%s2788_s11 + $0x58] sm:$0xff]  ;;  %v1778_v3 = vld [vmem:[%s2784_s7 + $0x8] sm:$0x3]  ;;  %v2320_v7 = vand.u32 127, %v521_v14 }
  0x1a   : > { %1869 = vmatprep.subr.bf16.mxu1 %v1868_v61  ;;  %v2317_v6 = vrot.slane %v1778_v3, %v2082_v21 }
  0x1b   : > { %744 = vperm.xlu0 %1931, %v1783_v11   ;;  %v1217_v11 = vld [vmem:[%s2788_s11 + $0x30] sm:$0xff]  ;;  %vm535_vm3 = vcmp.lt.s32.totalorder %v2320_v7, 17  ;;  %vm564_vm4 = vcmp.lt.s32.totalorder %v2320_v7, 16  ;;  %vm630_vm5 = vcmp.lt.s32.totalorder %v2320_v7, 1  ;;  %vm689_vm6 = vcmp.lt.s32.totalorder %v2320_v7, 127 }
  0x1c   : > { %777 = vperm.xlu1 %1932, %v1785_v12   ;;  %v1876_v12 = vpack.c.bf16 %v1234_v10, %v1233_v9  ;;  %2801 = vst [vmem:[#allocation2_spill] sm:$0xff] %v2317_v6  ;;  %vm597_vm7 = vcmp.lt.s32.totalorder %v2320_v7, 15  ;;  %vm755_vm8 = vcmp.lt.s32.totalorder %v2320_v7, 112  ;;  %vm722_vm9 = vcmp.lt.s32.totalorder %v2320_v7, 113 }
  0x1d   : > { %1871 = vmatpush3.bf16.msra.mxu1 %v1870_v0  ;;  %vm788_vm10 = vcmp.lt.s32.totalorder %v2320_v7, 111  ;;  %v1624_v7 = vld [vmem:[%s2779_s2] sm:$0xff] }
  0x1e   : > { %1873 = vmatprep.subr.bf16.mxu1 %v1872_v5 }
  0x1f   : > { %810 = vperm.xlu0 %1931, %v1787_v13   ;;  %v1218_v13 = vld [vmem:[%s2788_s11 + $0x38] sm:$0xff] }
  0x21   : > { %1875 = vmatpush3.bf16.msra.mxu1 %v1874_v8  ;;  %v2323_v8 = vrot.slane %v1778_v3, %v2086_v23 }
  0x22   : > { %1877 = vmatprep.subr.bf16.mxu1 %v1876_v12  ;;  %v1772_v12 = vld [vmem:[%s2784_s7 + $0x2] sm:$0x3] }
  0x23   : > { %2802 = vst [vmem:[#allocation3_spill] sm:$0xff] %v2323_v8 }
  0x8e   : > { %v2293_v53 = vpop.permute.xlu0 %555 }
  0x8f   : > { %v2295_v54 = vpop.permute.xlu1 %619 }
  0x92   : > { %v2297_v55 = vpop.permute.xlu0 %586 }
  0x93   : > { %v2299_v56 = vpop.permute.xlu1 %652 }
  0x96   : > { %v679_v57 = vpop.permute.xlu0 %678 }
  0x97   : > { %v2303_v59 = vpop.permute.xlu1 %711 }
  0x9a   : > { %v2301_v58 = vpop.permute.xlu0 %744 }
  0x9b   : > { %v2307_v61 = vpop.permute.xlu1 %777 }
  0x9e   : > { %v2305_v60 = vpop.permute.xlu0 %810 }
  0xe8   : > { %v514_v16 = vpop.f32.mrb[0].mxu0 }
  0xe9   : > { %v2080_v19 = vmax.f32 %v514_v16, 0.0  ;;  %v516_v20 = vpop.f32.mrb[1].mxu0  ;;  %v1878_v16 = vpack.c.bf16 %v1218_v13, %v1217_v11  ;;  %v538_v11 = vld [vmem:[%s2784_s7] sm:$0x3] }
  0xea   : > { %v2084_v22 = vmax.f32 %v516_v20, 0.0  ;;  %v1880_v20 = vpack.c.bf16 %v1236_v18, %v1235_v17  ;;  %v2344_v17 = vrot.slane %v1772_v12, %v2082_v21  ;;  %v2347_v18 = vrot.slane %v1772_v12, %v2086_v23 }
  0xeb   : > { %593 = vrot.lane.b32.xlu0 %v2080_v19, %s1947_s23  ;;  %529 = vrot.lane.b32.xlu1 %v2080_v19, %s1948_s24  ;;  %v827_v27 = vrot.slane %v2080_v19, 7  ;;  %v1053_v28 = vrot.slane %v2080_v19, 1  ;;  %v672_v13 = vmul.f32 %v2317_v6, %v2080_v19 }
  0xec   : > { %v828_v32 = vrot.slane %v2084_v22, 7  ;;  %v1054_v33 = vrot.slane %v2084_v22, 1  ;;  %1879 = vmatpush3.bf16.msra.mxu1 %v1878_v16  ;;  %v673_v14 = vmul.f32 %v2323_v8, %v2084_v22  ;;  %v2341_v16 = vrot.slane %v538_v11, %v2086_v23 }
  0xed   : > { %v829_v36 = vmul.f32 %v1770_v24, %v827_v27  ;;  %v2108_v37 = vmul.f32 %v1771_v25, %v1053_v28  ;;  %1881 = vmatprep.subr.bf16.mxu1 %v1880_v20  ;;  %v1237_v27 = vld [vmem:[%s2788_s11 + $0xd0] sm:$0xff]  ;;  %v1238_v28 = vld [vmem:[%s2788_s11 + $0xd8] sm:$0xff] }
  0xee   : > { %v830_v39 = vmul.f32 %v1770_v24, %v828_v32  ;;  %v2116_v41 = vmul.f32 %v1771_v25, %v1054_v33  ;;  %v1219_v24 = vld [vmem:[%s2788_s11 + $0x40] sm:$0xff]  ;;  %v1220_v25 = vld [vmem:[%s2788_s11 + $0x48] sm:$0xff] }
  0xef   : > { %718 = vrot.lane.b32.xlu0 %v2080_v19, %s2793_s28  ;;  %560 = vrot.lane.b32.xlu1 %v2080_v19, %s1950_s29  ;;  %v2120_v44 = vmul.f32 %v857_v29, %v829_v36  ;;  %v2124_v46 = vmul.f32 %v917_v30, %v829_v36  ;;  %v2129_v48 = vmul.f32 %v1086_v38, %v2108_v37  ;;  %v1221_v30 = vld [vmem:[%s2788_s11 + $0x50] sm:$0xff]  ;;  %v1239_v33 = vld [vmem:[%s2788_s11 + $0xe0] sm:$0xff] }
  0xf0   : > { %v2122_v45 = vmul.f32 %v861_v34, %v830_v39  ;;  %v2126_v47 = vmul.f32 %v921_v35, %v830_v39  ;;  %v2136_v49 = vmul.f32 %v1090_v42, %v2116_v41  ;;  %v2139_v50 = vmul.f32 %v1149_v40, %v2108_v37  ;;  %v1240_v34 = vld [vmem:[%s2788_s11 + $0xe8] sm:$0xff]  ;;  %v1242_v40 = vld [vmem:[%s2788_s11 + $0xf8] sm:$0xff] }
  0xf1   : > { %v2142_v51 = vmul.f32 %v1153_v43, %v2116_v41  ;;  %v1882_v26 = vpack.c.bf16 %v1220_v25, %v1219_v24  ;;  %v1884_v29 = vpack.c.bf16 %v1238_v28, %v1237_v27  ;;  %v1886_v32 = vpack.c.bf16 %v1222_v31, %v1221_v30  ;;  %v1226_v43 = vld [vmem:[%s2788_s11 + $0x78] sm:$0xff]  ;;  %v1776_v24 = vld [vmem:[%s2784_s7 + $0x6] sm:$0x3]  ;;  %v1780_v31 = vld [vmem:[%s2784_s7 + $0xa] sm:$0x3] }
  0xf2   : > { %v1888_v35 = vpack.c.bf16 %v1240_v34, %v1239_v33  ;;  %v2366_v30 = vmul.f32 %v679_v57, %v672_v13  ;;  %v2375_v33 = vmul.f32 %v679_v57, %v673_v14  ;;  %v2378_v34 = vrot.slane %v1776_v24, %v2082_v21 }
  0xf3   : > { %626 = vrot.lane.b32.xlu1 %v2080_v19, %s1951_s30  ;;  %531 = vrot.lane.b32.xlu0 %v2084_v22, %s1948_s24  ;;  %v2400_v57 = vrot.slane %v1780_v31, %v2086_v23 }
  0xf4   : > { %1883 = vmatpush3.bf16.msra.mxu1 %v1882_v26 }
  0xf5   : > { %1885 = vmatprep.subr.bf16.mxu1 %v1884_v29 }
  0xf7   : > { %685 = vrot.lane.b32.xlu1 %v2080_v19, %s1952_s14  ;;  %562 = vrot.lane.b32.xlu0 %v2084_v22, %s1950_s29 }
  0xf8   : > { %1887 = vmatpush3.bf16.msra.mxu1 %v1886_v32  ;;  %v1774_v32 = vld [vmem:[%s2784_s7 + $0x4] sm:$0x3] }
  0xf9   : > { %1889 = vmatprep.subr.bf16.mxu1 %v1888_v35  ;;  %v2381_v35 = vrot.slane %v1776_v24, %v2086_v23 }
  0xfb   : > { %751 = vrot.lane.b32.xlu1 %v2080_v19, %s1953_s15  ;;  %628 = vrot.lane.b32.xlu0 %v2084_v22, %s1951_s30 }
  0xff   : > { %784 = vrot.lane.b32.xlu1 %v2080_v19, %s2791_s16  ;;  %687 = vrot.lane.b32.xlu0 %v2084_v22, %s1952_s14 }
 0x103   : > { %595 = vrot.lane.b32.xlu1 %v2084_v22, %s1947_s23  ;;  %753 = vrot.lane.b32.xlu0 %v2084_v22, %s1953_s15 }
 0x107   : > { %720 = vrot.lane.b32.xlu1 %v2084_v22, %s2793_s28  ;;  %786 = vrot.lane.b32.xlu0 %v2084_v22, %s2791_s16 }
 0x10b   : > { %832 = vrot.lane.b32.xlu1 %v829_v36, %s1951_s30  ;;  %870 = vrot.lane.b32.xlu0 %v829_v36, %s1952_s14 }
 0x10f   : > { %930 = vrot.lane.b32.xlu1 %v829_v36, %s1953_s15  ;;  %892 = vrot.lane.b32.xlu0 %v829_v36, %s1950_s29  ;;  %v1223_v36 = vld [vmem:[%s2788_s11 + $0x60] sm:$0xff] }
 0x113   : > { %1059 = vrot.lane.b32.xlu1 %v2108_v37, %s1951_s30  ;;  %834 = vrot.lane.b32.xlu0 %v830_v39, %s1951_s30 }
 0x117   : > { %1122 = vrot.lane.b32.xlu1 %v2108_v37, %s1950_s29  ;;  %1099 = vrot.lane.b32.xlu0 %v2108_v37, %s1952_s14 }
 0x11b   : > { %872 = vrot.lane.b32.xlu1 %v830_v39, %s1952_s14  ;;  %1189 = vperm.xlu0 %1931, %v1804_v52  }
 0x11f   : > { %894 = vrot.lane.b32.xlu1 %v830_v39, %s1950_s29  ;;  %932 = vrot.lane.b32.xlu0 %v830_v39, %s1953_s15  ;;  %v1241_v39 = vld [vmem:[%s2788_s11 + $0xf0] sm:$0xff] }
 0x120   : > { %v1892_v42 = vpack.c.bf16 %v1242_v40, %v1241_v39 }
 0x123   : > { %822 = vperm.xlu1 %1932, %v817_v2   ;;  %1061 = vrot.lane.b32.xlu0 %v2116_v41, %s1951_s30 }
 0x127   : > { %1162 = vrot.lane.b32.xlu1 %v2108_v37, %s1953_s15  ;;  %1124 = vrot.lane.b32.xlu0 %v2116_v41, %s1950_s29  ;;  %v1224_v37 = vld [vmem:[%s2788_s11 + $0x68] sm:$0xff] }
 0x128   : > { %v1890_v38 = vpack.c.bf16 %v1224_v37, %v1223_v36 }
 0x12a   : > { %1891 = vmatpush3.bf16.msra.mxu1 %v1890_v38 }
 0x12b   : > { %1101 = vrot.lane.b32.xlu1 %v2116_v41, %s1952_s14  ;;  %1164 = vrot.lane.b32.xlu0 %v2116_v41, %s1953_s15  ;;  %v1225_v41 = vld [vmem:[%s2788_s11 + $0x70] sm:$0xff] }
 0x12c   : > { %v1894_v52 = vpack.c.bf16 %v1226_v43, %v1225_v41  ;;  %1893 = vmatprep.subr.bf16.mxu1 %v1892_v42  ;;  %v1784_v42 = vld [vmem:[%s2784_s7 + $0xe] sm:$0x3]  ;;  %v1782_v43 = vld [vmem:[%s2784_s7 + $0xc] sm:$0x3] }
 0x12d   : > { %v2426_v12 = vrot.slane %v1782_v43, %v2082_v21 }
 0x12e   : > { %1895 = vmatpush3.bf16.msra.mxu1 %v1894_v52  ;;  %v2397_v52 = vrot.slane %v1780_v31, %v2082_v21 }
 0x12f   : > { %1202 = vperm.xlu1 %1932, %v1805_v15   ;;  %v2338_v15 = vrot.slane %v538_v11, %v2082_v21  ;;  %v2422_v11 = vrot.slane %v1784_v42, %v2086_v23 }
 0x15d   : > { %v2309_v62 = vpop.permute.xlu0 %593  ;;  %v530_v63 = vpop.permute.xlu1 %529 }
 0x161   : > { %v2311_v0 = vpop.permute.xlu0 %718  ;;  %v561_v2 = vpop.permute.xlu1 %560 }
 0x165   : > { %v627_v4 = vpop.permute.xlu1 %626  ;;  %v532_v5 = vpop.permute.xlu0 %531 }
 0x166   : > { %v536_v26 = vsel %vm535_vm3, %v530_v63, %v532_v5  ;;  %v537_v27 = vsel %vm535_vm3, %v532_v5, %v530_v63  ;;  %v2404_v63 = vrot.slane %v1774_v32, %v2082_v21  ;;  %v2415_v5 = vrot.slane %v1774_v32, %v2086_v23 }
 0x167   : > { %v550_v36 = vmul.f32 %v2338_v15, %v537_v27  ;;  %v551_v37 = vmul.f32 %v2341_v16, %v536_v26  ;;  %v1786_v27 = vld [vmem:[%s2784_s7 + $0x10] sm:$0x3] }
 0x168   : > { %2803 = vst [vmem:[#allocation4_spill] sm:$0xff] %v2404_v63  ;;  %v2460_v1 = vrot.slane %v1786_v27, %v2082_v21 }
 0x169   : > { %v686_v9 = vpop.permute.xlu1 %685  ;;  %v563_v10 = vpop.permute.xlu0 %562  ;;  %v558_v13 = vmul.f32 %v2293_v53, %v550_v36 }
 0x16a   : > { %v2360_v28 = vsel %vm564_vm4, %v561_v2, %v563_v10  ;;  %v2364_v29 = vsel %vm564_vm4, %v563_v10, %v561_v2  ;;  %v2419_v10 = vrot.slane %v1784_v42, %v2082_v21  ;;  %v2456_v42 = vrot.slane %v1782_v43, %v2086_v23  ;;  %2804 = vst [vmem:[#allocation5_spill] sm:$0xff] %v2460_v1 }
 0x16b   : > { %v580_v38 = vmul.f32 %v2344_v17, %v2364_v29  ;;  %v581_v39 = vmul.f32 %v2347_v18, %v2360_v28 }
 0x16d   : > { %v2349_v20 = vpop.permute.xlu1 %751  ;;  %v629_v25 = vpop.permute.xlu0 %628  ;;  %v589_v14 = vmul.f32 %v2297_v55, %v580_v38  ;;  %v590_v24 = vmul.f32 %v2297_v55, %v581_v39 }
 0x16e   : > { %v2408_v2 = vsel %vm630_vm5, %v627_v4, %v629_v25  ;;  %v2412_v3 = vsel %vm630_vm5, %v629_v25, %v627_v4  ;;  %v559_v4 = vmul.f32 %v2293_v53, %v551_v37 }
 0x16f   : > { %v646_v31 = vmul.f32 %v2378_v34, %v2412_v3  ;;  %v647_v32 = vmul.f32 %v2381_v35, %v2408_v2 }
 0x170   : > { %v592_v6 = vadd.f32 %v590_v24, %v559_v4 }
 0x171   : > { %v785_v40 = vpop.permute.xlu1 %784  ;;  %v688_v41 = vpop.permute.xlu0 %687  ;;  %v655_v4 = vmul.f32 %v2299_v56, %v646_v31 }
 0x172   : > { %v2447_v36 = vsel %vm689_vm6, %v686_v9, %v688_v41  ;;  %v2451_v37 = vsel %vm689_vm6, %v688_v41, %v686_v9 }
 0x173   : > { %v705_v43 = vmul.f32 %v2397_v52, %v2447_v36 }
 0x175   : > { %v596_v25 = vpop.permute.xlu1 %595  ;;  %v754_v26 = vpop.permute.xlu0 %753 }
 0x176   : > { %v598_v53 = vsel %vm597_vm7, %v2309_v62, %v596_v25  ;;  %v599_v55 = vsel %vm597_vm7, %v596_v25, %v2309_v62  ;;  %v2463_v62 = vrot.slane %v1786_v27, %v2086_v23  ;;  %v591_v25 = vadd.f32 %v589_v14, %v558_v13 }
 0x177   : > { %v613_v38 = vmul.f32 %v2404_v63, %v599_v55  ;;  %v614_v39 = vmul.f32 %v2415_v5, %v598_v53  ;;  %v706_v53 = vmul.f32 %v2400_v57, %v2451_v37  ;;  %v2482_v27 = vsel %vm755_vm8, %v2349_v20, %v754_v26 }
 0x179   : > { %v622_v9 = vmul.f32 %v2295_v54, %v613_v38  ;;  %v623_v41 = vmul.f32 %v2295_v54, %v614_v39  ;;  %v721_v55 = vpop.permute.xlu1 %720  ;;  %v787_v8 = vpop.permute.xlu0 %786  ;;  %v656_v54 = vmul.f32 %v2299_v56, %v647_v32  ;;  %v2487_v38 = vsel %vm755_vm8, %v754_v26, %v2349_v20 }
 0x17a   : > { %v723_v63 = vsel %vm722_vm9, %v2311_v0, %v721_v55  ;;  %v724_v13 = vsel %vm722_vm9, %v721_v55, %v2311_v0  ;;  %v789_v39 = vsel %vm788_vm10, %v785_v40, %v787_v8  ;;  %v790_v0 = vsel %vm788_vm10, %v787_v8, %v785_v40 }
 0x17b   : > { %v624_v14 = vadd.f32 %v622_v9, %v591_v25  ;;  %v625_v24 = vadd.f32 %v623_v41, %v592_v6  ;;  %v738_v6 = vmul.f32 %v2426_v12, %v723_v63  ;;  %v739_v32 = vmul.f32 %v2456_v42, %v724_v13  ;;  %v831_v63 = vld [vmem:[%s2781_s4] sm:$0x3] }
 0x17c   : > { %v714_v41 = vmul.f32 %v2303_v59, %v705_v43  ;;  %v715_v55 = vmul.f32 %v2303_v59, %v706_v53  ;;  %v771_v20 = vmul.f32 %v2419_v10, %v2482_v27  ;;  %v772_v26 = vmul.f32 %v2422_v11, %v2487_v38 }
 0x17d   : > { %v657_v31 = vadd.f32 %v655_v4, %v624_v14  ;;  %v658_v56 = vadd.f32 %v656_v54, %v625_v24  ;;  %v833_v25 = vpop.permute.xlu1 %832  ;;  %v871_v9 = vpop.permute.xlu0 %870  ;;  %v804_v13 = vmul.f32 %v2460_v1, %v789_v39  ;;  %v805_v43 = vmul.f32 %v2463_v62, %v790_v0 }
 0x17e   : > { %v747_v53 = vmul.f32 %v2301_v58, %v738_v6  ;;  %v748_v54 = vmul.f32 %v2301_v58, %v739_v32 }
 0x17f   : > { %v683_v8 = vadd.f32 %v2366_v30, %v657_v31  ;;  %v684_v40 = vadd.f32 %v2375_v33, %v658_v56  ;;  %v842_v30 = vrot.slane %v831_v63, %v2082_v21  ;;  %v846_v33 = vrot.slane %v831_v63, %v2086_v23 }
 0x180   : > { %v780_v31 = vmul.f32 %v2307_v61, %v771_v20  ;;  %v781_v56 = vmul.f32 %v2307_v61, %v772_v26  ;;  %v813_v0 = vmul.f32 %v2305_v60, %v804_v13 }
 0x181   : > { %v716_v4 = vadd.f32 %v714_v41, %v683_v8  ;;  %v717_v59 = vadd.f32 %v715_v55, %v684_v40  ;;  %v2510_v14 = vpop.permute.xlu1 %930  ;;  %v893_v24 = vpop.permute.xlu0 %892  ;;  %v814_v41 = vmul.f32 %v2305_v60, %v805_v43  ;;  %v1789_v60 = vld [vmem:[%s2781_s4 + $0x4] sm:$0x3] }
 0x183   : > { %v749_v39 = vadd.f32 %v747_v53, %v716_v4  ;;  %v750_v1 = vadd.f32 %v748_v54, %v717_v59  ;;  %v880_v4 = vrot.slane %v1789_v60, %v2082_v21  ;;  %v884_v59 = vrot.slane %v1789_v60, %v2086_v23  ;;  %v1793_v53 = vld [vmem:[%s2781_s4 + $0x8] sm:$0x3] }
 0x185   : > { %v2518_v6 = vpop.permute.xlu1 %1059  ;;  %v835_v58 = vpop.permute.xlu0 %834  ;;  %v782_v32 = vadd.f32 %v780_v31, %v749_v39  ;;  %v783_v55 = vadd.f32 %v781_v56, %v750_v1  ;;  %v974_v39 = vrot.slane %v1793_v53, %v2082_v21 }
 0x186   : > { %v836_v8 = vsel %vm630_vm5, %v833_v25, %v835_v58  ;;  %v837_v40 = vsel %vm630_vm5, %v835_v58, %v833_v25  ;;  %v1792_v25 = vld [vmem:[%s2781_s4 + $0x6] sm:$0x3] }
 0x187   : > { %v849_v20 = vmul.f32 %v842_v30, %v837_v40  ;;  %v850_v63 = vmul.f32 %v846_v33, %v836_v8  ;;  %v2524_v61 = vadd.f32 %v813_v0, %v782_v32  ;;  %v2526_v26 = vadd.f32 %v814_v41, %v783_v55  ;;  %v1794_v30 = vld [vmem:[%s2781_s4 + $0xa] sm:$0x3] }
 0x188   : > { %v961_v54 = vrot.slane %v1792_v25, %v2086_v23  ;;  %v978_v0 = vrot.slane %v1793_v53, %v2086_v23  ;;  %v991_v8 = vrot.slane %v1794_v30, %v2082_v21  ;;  %v995_v40 = vrot.slane %v1794_v30, %v2086_v23 }
 0x189   : > { %v866_v13 = vadd.f32 %v2120_v44, %v849_v20  ;;  %v867_v1 = vadd.f32 %v2122_v45, %v850_v63  ;;  %v2533_v43 = vpop.permute.xlu1 %1122  ;;  %v891_v44 = vld [vmem:[%s2782_s5] sm:$0x3]  ;;  %v957_v45 = vrot.slane %v1792_v25, %v2082_v21 }
 0x18a   : > { %v902_v32 = vrot.slane %v891_v44, %v2082_v21  ;;  %v906_v55 = vrot.slane %v891_v44, %v2086_v23  ;;  %v965_v63 = vmul.f32 %v961_v54, %v2408_v2  ;;  %v982_v44 = vmul.f32 %v978_v0, %v2084_v22  ;;  %v1791_v0 = vld [vmem:[%s2782_s5 + $0xc] sm:$0x3] }
 0x18b   : > { %v964_v20 = vmul.f32 %v957_v45, %v2412_v3  ;;  %v998_v3 = vmul.f32 %v991_v8, %v2447_v36  ;;  %v999_v2 = vmul.f32 %v995_v40, %v2451_v37  ;;  %v1796_v36 = vld [vmem:[%s2782_s5 + $0x8] sm:$0x3]  ;;  %v944_v37 = vrot.slane %v1791_v0, %v2086_v23 }
 0x18c   : > { %v1029_v8 = vrot.slane %v1796_v36, %v2086_v23 }
 0x18d   : > { %v873_v33 = vpop.permute.xlu1 %872 }
 0x18e   : > { %v874_v31 = vsel %vm689_vm6, %v871_v9, %v873_v33  ;;  %v875_v56 = vsel %vm689_vm6, %v873_v33, %v871_v9 }
 0x18f   : > { %v887_v41 = vmul.f32 %v880_v4, %v874_v31  ;;  %v888_v58 = vmul.f32 %v884_v59, %v875_v56  ;;  %v981_v59 = vmul.f32 %v974_v39, %v2080_v19 }
 0x191   : > { %v889_v60 = vadd.f32 %v887_v41, %v866_v13  ;;  %v890_v9 = vadd.f32 %v888_v58, %v867_v1  ;;  %v895_v25 = vpop.permute.xlu1 %894  ;;  %v2573_v41 = vpop.permute.xlu0 %1099 }
 0x192   : > { %v896_v53 = vsel %vm564_vm4, %v893_v24, %v895_v25  ;;  %v897_v4 = vsel %vm564_vm4, %v895_v25, %v893_v24 }
 0x193   : > { %v966_v33 = vadd.f32 %v964_v20, %v889_v60  ;;  %v967_v31 = vadd.f32 %v965_v63, %v890_v9  ;;  %v909_v30 = vmul.f32 %v902_v32, %v897_v4  ;;  %v910_v56 = vmul.f32 %v906_v55, %v896_v53  ;;  %v1798_v32 = vld [vmem:[%s2781_s4 + $0xc] sm:$0x3]  ;;  %v1797_v63 = vld [vmem:[%s2782_s5 + $0xe] sm:$0x3] }
 0x194   : > { %v1025_v55 = vrot.slane %v1796_v36, %v2082_v21 }
 0x195   : > { %v926_v13 = vadd.f32 %v2124_v46, %v909_v30  ;;  %v927_v1 = vadd.f32 %v2126_v47, %v910_v56  ;;  %v983_v45 = vadd.f32 %v981_v59, %v966_v33  ;;  %v984_v54 = vadd.f32 %v982_v44, %v967_v31  ;;  %v1795_v46 = vld [vmem:[%s2782_s5 + $0x2] sm:$0x3]  ;;  %v1801_v33 = vld [vmem:[%s2782_s5 + $0x4] sm:$0x3] }
 0x196   : > { %v940_v47 = vrot.slane %v1791_v0, %v2082_v21  ;;  %v1008_v40 = vrot.slane %v1795_v46, %v2082_v21  ;;  %v1012_v20 = vrot.slane %v1795_v46, %v2086_v23  ;;  %v1069_v59 = vrot.slane %v1798_v32, %v2082_v21  ;;  %v1800_v46 = vld [vmem:[%s2781_s4 + $0x10] sm:$0x3] }
 0x197   : > { %v1000_v24 = vadd.f32 %v998_v3, %v983_v45  ;;  %v1001_v39 = vadd.f32 %v999_v2, %v984_v54  ;;  %v1073_v44 = vrot.slane %v1798_v32, %v2086_v23  ;;  %v1042_v31 = vrot.slane %v1797_v63, %v2082_v21 }
 0x198   : > { %v1046_v30 = vrot.slane %v1797_v63, %v2086_v23  ;;  %v1032_v56 = vmul.f32 %v1025_v55, %v2080_v19  ;;  %v1033_v3 = vmul.f32 %v1029_v8, %v2084_v22  ;;  %v1016_v2 = vmul.f32 %v1012_v20, %v2360_v28  ;;  %v1803_v8 = vld [vmem:[%s2782_s5 + $0x10] sm:$0x3] }
 0x199   : > { %v1136_v28 = vrot.slane %v1801_v33, %v2086_v23  ;;  %v1109_v63 = vrot.slane %v1800_v46, %v2082_v21 }
 0x19a   : > { %v2578_v58 = vpop.permute.xlu0 %1189  ;;  %v1050_v20 = vmul.f32 %v1046_v30, %v2487_v38  ;;  %v1172_v38 = vrot.slane %v1803_v8, %v2082_v21 }
 0x19e   : > { %v933_v60 = vpop.permute.xlu0 %932 }
 0x19f   : > { %v934_v9 = vsel %vm755_vm8, %v2510_v14, %v933_v60  ;;  %v935_v25 = vsel %vm755_vm8, %v933_v60, %v2510_v14  ;;  %v1015_v14 = vmul.f32 %v1008_v40, %v2364_v29  ;;  %v1132_v29 = vrot.slane %v1801_v33, %v2082_v21 }
 0x1a0   : > { %v947_v53 = vmul.f32 %v940_v47, %v934_v9  ;;  %v948_v4 = vmul.f32 %v944_v37, %v935_v25  ;;  %v1049_v40 = vmul.f32 %v1042_v31, %v2482_v27 }
 0x1a2   : > { %v949_v45 = vadd.f32 %v947_v53, %v926_v13  ;;  %v950_v54 = vadd.f32 %v948_v4, %v927_v1  ;;  %v823_v0 = vpop.permute.xlu1 %822  ;;  %v1062_v36 = vpop.permute.xlu0 %1061 }
 0x1a3   : > { %v1063_v47 = vsel %vm630_vm5, %v2518_v6, %v1062_v36  ;;  %v1064_v37 = vsel %vm630_vm5, %v1062_v36, %v2518_v6  ;;  %v1113_v6 = vrot.slane %v1800_v46, %v2086_v23 }
 0x1a4   : > { %v1017_v13 = vadd.f32 %v1015_v14, %v949_v45  ;;  %v1018_v1 = vadd.f32 %v1016_v2, %v950_v54  ;;  %v1076_v32 = vmul.f32 %v1069_v59, %v1064_v37  ;;  %v1077_v55 = vmul.f32 %v1073_v44, %v1063_v47 }
 0x1a5   : > { %v1176_v44 = vrot.slane %v1803_v8, %v2086_v23 }
 0x1a6   : > { %v1078_v60 = vadd.f32 %v1076_v32, %v1000_v24  ;;  %v1079_v9 = vadd.f32 %v1077_v55, %v1001_v39  ;;  %v1163_v25 = vpop.permute.xlu1 %1162  ;;  %v1034_v53 = vadd.f32 %v1032_v56, %v1017_v13  ;;  %v1125_v4 = vpop.permute.xlu0 %1124  ;;  %v1035_v33 = vadd.f32 %v1033_v3, %v1018_v1 }
 0x1a7   : > { %v1126_v59 = vsel %vm564_vm4, %v2533_v43, %v1125_v4  ;;  %v1127_v27 = vsel %vm564_vm4, %v1125_v4, %v2533_v43  ;;  %v819_v55 = vmax.f32 %v2526_v26, 0.0 }
 0x1a8   : > { %v1051_v31 = vadd.f32 %v1049_v40, %v1034_v53  ;;  %v1052_v30 = vadd.f32 %v1050_v20, %v1035_v33  ;;  %v1139_v24 = vmul.f32 %v1132_v29, %v1127_v27  ;;  %v1140_v39 = vmul.f32 %v1136_v28, %v1126_v59 }
 0x1a9   : > { %v1095_v56 = vadd.f32 %v2129_v48, %v1078_v60  ;;  %v1096_v3 = vadd.f32 %v2136_v49, %v1079_v9 }
 0x1aa   : > { %v1141_v14 = vadd.f32 %v1139_v24, %v1051_v31  ;;  %v1142_v2 = vadd.f32 %v1140_v39, %v1052_v30  ;;  %v1102_v45 = vpop.permute.xlu1 %1101  ;;  %v1165_v54 = vpop.permute.xlu0 %1164  ;;  %v1313_v31 = vld [vmem:[%s2785_s8] sm:$0x3] }
 0x1ab   : > { %v1103_v43 = vsel %vm689_vm6, %v2573_v41, %v1102_v45  ;;  %v1104_v21 = vsel %vm689_vm6, %v1102_v45, %v2573_v41  ;;  %v1166_v23 = vsel %vm755_vm8, %v1163_v25, %v1165_v54  ;;  %v1167_v48 = vsel %vm755_vm8, %v1165_v54, %v1163_v25 }
 0x1ac   : > { %v1116_v36 = vmul.f32 %v1109_v63, %v1103_v43  ;;  %v1117_v49 = vmul.f32 %v1113_v6, %v1104_v21  ;;  %v1179_v46 = vmul.f32 %v1172_v38, %v1166_v23  ;;  %v1180_v47 = vmul.f32 %v1176_v44, %v1167_v48 }
 0x1ad   : > { %v1158_v37 = vadd.f32 %v2139_v50, %v1141_v14  ;;  %v1159_v29 = vadd.f32 %v2142_v51, %v1142_v2  ;;  %v818_v41 = vmax.f32 %v2524_v61, 0.0  ;;  %v826_v6 = vmul.f32 %v823_v0, %v819_v55 }
 0x1ae   : > { %v1118_v28 = vadd.f32 %v1116_v36, %v1095_v56  ;;  %v1119_v13 = vadd.f32 %v1117_v49, %v1096_v3  ;;  %v1203_v25 = vpop.permute.xlu1 %1202 }
 0x1af   : > { %v1181_v1 = vadd.f32 %v1179_v46, %v1158_v37  ;;  %v1182_v32 = vadd.f32 %v1180_v47, %v1159_v29  ;;  %v825_v63 = vmul.f32 %v823_v0, %v818_v41 }
 0x1b0   : > { %v1185_v8 = vmax.f32 %v1118_v28, 0.0  ;;  %v1186_v40 = vmax.f32 %v1119_v13, 0.0 }
 0x1b1   : > { %v1198_v20 = vmax.f32 %v1181_v1, 0.0  ;;  %v1199_v60 = vmax.f32 %v1182_v32, 0.0 }
 0x1b2   : > { %v1192_v9 = vmul.f32 %v2578_v58, %v1185_v8  ;;  %v1193_v50 = vmul.f32 %v2578_v58, %v1186_v40  ;;  %v2807_v58 = vmov 0.0  }
 0x1b3   : > { %v1205_v4 = vmul.f32 %v1203_v25, %v1198_v20  ;;  %v1206_v33 = vmul.f32 %v1203_v25, %v1199_v60  ;;  %1856 = vmatprep.mubr.msk.f32.mxu0 %vm1955_vm11, %v2807_v58 }
 0x1b4   : > { %v1194_v51 = vadd.f32 %v1192_v9, %v825_v63  ;;  %v1195_v53 = vadd.f32 %v1193_v50, %v826_v6 }
 0x1b6   : > { %v1207_v59 = vadd.f32 %v1205_v4, %v1194_v51  ;;  %v1208_v27 = vadd.f32 %v1206_v33, %v1195_v53  ;;  %v2808_v51 = vld [vmem:[#allocation4_spill] sm:$0xff]  ;;  %v2809_v4 = vld [vmem:[#allocation3_spill] sm:$0xff] }
 0x1b8   : > { %v2659_v61 = vmax.f32 %v1207_v59, 0.0  ;;  %v2661_v26 = vmax.f32 %v1208_v27, 0.0 }
 0x1ba   : > { %1473 = vrot.lane.b32.xlu0 %v2659_v61, %s1948_s24  ;;  %1475 = vrot.lane.b32.xlu1 %v2661_v26, %s1948_s24  ;;  %s2805_s24 = smov 113  }
 0x1bb   : > { %1307 = vmatprep.mubr.f32.mxu1 %v2661_v26 }
 0x1bc   : > { %1308 = vmatmul.mubr.f32.vlgmr.msra.gmra.mrb[0].mxu1 %v2659_v61 }
 0x1be   : > { %1481 = vrot.lane.b32.xlu0 %v2659_v61, %s1950_s29  ;;  %1483 = vrot.lane.b32.xlu1 %v2661_v26, %s1950_s29 }
 0x1c2   : > { %1489 = vrot.lane.b32.xlu0 %v2659_v61, %s1947_s23  ;;  %1491 = vrot.lane.b32.xlu1 %v2661_v26, %s1947_s23  ;;  %s2806_s23 = smov 111  }
 0x1c6   : > { %1497 = vrot.lane.b32.xlu0 %v2659_v61, %s1951_s30  ;;  %1499 = vrot.lane.b32.xlu1 %v2661_v26, %s1951_s30 }
 0x1ca   : > { %1507 = vrot.lane.b32.xlu0 %v2659_v61, %s1952_s14  ;;  %1509 = vrot.lane.b32.xlu1 %v2661_v26, %s1952_s14 }
 0x1ce   : > { %1515 = vrot.lane.b32.xlu0 %v2659_v61, %s2805_s24  ;;  %1517 = vrot.lane.b32.xlu1 %v2661_v26, %s2805_s24 }
 0x1d2   : > { %1523 = vrot.lane.b32.xlu0 %v2659_v61, %s1953_s15  ;;  %1525 = vrot.lane.b32.xlu1 %v2661_v26, %s1953_s15 }
 0x1d6   : > { %1531 = vrot.lane.b32.xlu0 %v2659_v61, %s2806_s23  ;;  %1533 = vrot.lane.b32.xlu1 %v2661_v26, %s2806_s23 }
 0x22c   : > { %v1474_v30 = vpop.permute.xlu0 %1473  ;;  %v1476_v24 = vpop.permute.xlu1 %1475 }
 0x22d   : > { %v1477_v49 = vsel %vm535_vm3, %v1474_v30, %v1476_v24  ;;  %v1478_v47 = vsel %vm535_vm3, %v1476_v24, %v1474_v30 }
 0x22e   : > { %v1480_v13 = vmul.f32 %v1477_v49, %v2341_v16  ;;  %v1479_v55 = vmul.f32 %v1478_v47, %v2338_v15 }
 0x230   : > { %v1482_v39 = vpop.permute.xlu0 %1481  ;;  %v1484_v56 = vpop.permute.xlu1 %1483 }
 0x231   : > { %v1485_v21 = vsel %vm564_vm4, %v1482_v39, %v1484_v56  ;;  %v1486_v23 = vsel %vm564_vm4, %v1484_v56, %v1482_v39 }
 0x232   : > { %v1488_v37 = vmul.f32 %v1485_v21, %v2347_v18  ;;  %v1487_v29 = vmul.f32 %v1486_v23, %v2344_v17  ;;  %v1388_v17 = vld [vmem:[%s2786_s9] sm:$0xff] }
 0x234   : > { %v1490_v3 = vpop.permute.xlu0 %1489  ;;  %v1492_v14 = vpop.permute.xlu1 %1491  ;;  %v1896_v63 = vpack.c.bf16 %v1488_v37, %v1480_v13  ;;  %v1898_v6 = vpack.c.bf16 %v1487_v29, %v1479_v55 }
 0x235   : > { %v1493_v28 = vsel %vm597_vm7, %v1490_v3, %v1492_v14  ;;  %v1494_v16 = vsel %vm597_vm7, %v1492_v14, %v1490_v3 }
 0x236   : > { %v1496_v20 = vmul.f32 %v1493_v28, %v2415_v5  ;;  %v1495_v53 = vmul.f32 %v1494_v16, %v2808_v51 }
 0x238   : > { %v1498_v2 = vpop.permute.xlu0 %1497  ;;  %v1500_v45 = vpop.permute.xlu1 %1499 }
 0x239   : > { %v1501_v46 = vsel %vm630_vm5, %v1498_v2, %v1500_v45  ;;  %v1502_v1 = vsel %vm630_vm5, %v1500_v45, %v1498_v2  ;;  %v2811_v45 = vld [vmem:[#allocation5_spill] sm:$0xff] }
 0x23a   : > { %v1504_v32 = vmul.f32 %v1501_v46, %v2381_v35  ;;  %v1503_v15 = vmul.f32 %v1502_v1, %v2378_v34  ;;  %v1506_v34 = vmul.f32 %v2661_v26, %v2809_v4 }
 0x23c   : > { %v1508_v54 = vpop.permute.xlu0 %1507  ;;  %v1510_v43 = vpop.permute.xlu1 %1509  ;;  %v1900_v25 = vpack.c.bf16 %v1504_v32, %v1496_v20  ;;  %v1902_v33 = vpack.c.bf16 %v1503_v15, %v1495_v53 }
 0x23d   : > { %v1512_v8 = vsel %vm689_vm6, %v1510_v43, %v1508_v54  ;;  %v1511_v9 = vsel %vm689_vm6, %v1508_v54, %v1510_v43 }
 0x23e   : > { %v1514_v50 = vmul.f32 %v1512_v8, %v2400_v57  ;;  %v1513_v59 = vmul.f32 %v1511_v9, %v2397_v52 }
 0x240   : > { %v1516_v48 = vpop.permute.xlu0 %1515  ;;  %v1518_v36 = vpop.permute.xlu1 %1517 }
 0x241   : > { %v1520_v57 = vsel %vm722_vm9, %v1518_v36, %v1516_v48  ;;  %v1519_v30 = vsel %vm722_vm9, %v1516_v48, %v1518_v36 }
 0x242   : > { %v1522_v26 = vmul.f32 %v1520_v57, %v2456_v42  ;;  %v1521_v14 = vmul.f32 %v1519_v30, %v2426_v12 }
 0x244   : > { %v1524_v35 = vpop.permute.xlu0 %1523  ;;  %v1526_v60 = vpop.permute.xlu1 %1525 }
 0x245   : > { %v1528_v5 = vsel %vm755_vm8, %v1526_v60, %v1524_v35  ;;  %v1527_v27 = vsel %vm755_vm8, %v1524_v35, %v1526_v60 }
 0x246   : > { %v1529_v56 = vmul.f32 %v1527_v27, %v2419_v10  ;;  %v1539_v10 = vld [vmem:[%s2787_s10] sm:$0xff] }
 0x248   : > { %v1532_v24 = vpop.permute.xlu0 %1531  ;;  %v1534_v52 = vpop.permute.xlu1 %1533 }
 0x249   : > { %v1535_v2 = vsel %vm788_vm10, %v1532_v24, %v1534_v52 }
 0x24a   : > { %v1537_v54 = vmul.f32 %v1535_v2, %v2811_v45 }
 0x28f   : > { %v1847_v0 = vpop.f32.mrb[0].mxu1 }
 0x290   : > { %v1848_v38 = vpop.f32.mrb[1].mxu1 }
 0x291   : > { %v1849_v44 = vadd.f32 %v1848_v38, %v1847_v0  ;;  %v1530_v0 = vmul.f32 %v1528_v5, %v2422_v11  ;;  %v1904_v38 = vpack.c.bf16 %v1514_v50, %v1506_v34  ;;  %v1536_v11 = vsel %vm788_vm10, %v1534_v52, %v1532_v24 }
 0x292   : > { %v1538_v42 = vmul.f32 %v1536_v11, %v2463_v62 }
 0x293   : > { %1855 = vmatpush3.msra.mxu0 %v1849_v44  ;;  %v2810_v44 = vld [vmem:[#allocation2_spill] sm:$0xff]  ;;  %v1908_v3 = vpack.c.bf16 %v1530_v0, %v1522_v26 }
 0x294   : > { %1857 = vmatmul.mubr.msk.f32.vlgmr.msra.gmra.mrb[2].mxu0 %vm444_vm0, %v1313_v31  ;;  %1859 = vmatprep.subr.mxu0 %v2807_v58  ;;  %v1505_v31 = vmul.f32 %v2659_v61, %v2810_v44  ;;  %v1910_v61 = vpack.c.bf16 %v1529_v56, %v1521_v14 }
 0x295   : > { %1861 = vmatprep.mubr.msk.f32.mxu0 %vm1955_vm11, %v2807_v58 }
 0x296   : > { %v1906_v39 = vpack.c.bf16 %v1513_v59, %v1505_v31 }
 0x367   : > { %v1383_v41 = vpop.f32.mrb[2].mxu0 }
 0x368   : > { %v1387_v18 = vmax.f32 %v1383_v41, 0.0  ;;  %v1858_v40 = vpop.f32.mrb[3].mxu0 }
 0x36a   : > { %1860 = vmatpush3.msk.msra.mxu0 %vm1393_vm12, %v1387_v18 }
 0x36b   : > { %1862 = vmatmul.mubr.msk.f32.vlgmr.msra.gmra.mrb[4].mxu0 %vm1389_vm13, %v1388_v17  ;;  %1897 = vmatprep.subr.bf16.mxu0 %v1896_v63 }
 0x36c   : > { %1899 = vmatpush1.bf16.msra.mxu0 %v1898_v6  ;;  %1608 = vmatprep.mubr.f32.mxu0 %v2807_v58 }
 0x36d   : > { %1901 = vmatprep.subr.bf16.mxu0 %v1900_v25 }
 0x370   : > { %1903 = vmatpush1.bf16.msra.mxu0 %v1902_v33 }
 0x371   : > { %1905 = vmatprep.subr.bf16.mxu0 %v1904_v38 }
 0x374   : > { %1907 = vmatpush1.bf16.msra.mxu0 %v1906_v39 }
 0x375   : > { %1909 = vmatprep.subr.bf16.mxu0 %v1908_v3 }
 0x378   : > { %1911 = vmatpush1.bf16.msra.mxu0 %v1910_v61 }
 0x379   : > { %1560 = vmatprep.subr.mxu0 %v1538_v42 }
 0x37c   : > { %1561 = vmatpush1.msra.mxu0 %v1537_v54 }
 0x37d   : > { %1628 = vmatprep.subr.mxu0 %v2084_v22  ;;  %1809 = vmatmul.mubr.msk.f32.vlgmr.msra.gmra.mrb[6].mxu0 %vm1540_vm14, %v1539_v10 }
 0x37e   : > { %1629 = vmatpush1.msra.mxu0 %v2080_v19  ;;  %1692 = vmatprep.mubr.f32.mxu0 %v2807_v58 }
 0x381   : > { %1810 = vmatmul.mubr.msk.f32.vlgmr.msra.gmra.mrb[8].mxu0 %vm444_vm0, %v1624_v7 }
 0x43e   : > { %v1463_v12 = vpop.f32.mrb[4].mxu0 }
 0x43f   : > { %v1467_v62 = vsub.f32 0.0, %v1463_v12  ;;  %v1863_v43 = vpop.f32.mrb[5].mxu0 }
 0x441   : > { %v1468_v21 = vmul.f32 1.442695, %v1467_v62 }
 0x443   : > { %1933 = vpow2.f32 %v1468_v21 }
 0x44d   : > { %v1934_v23 = vpop.eup %1933 }
 0x44e   : > { %v1470_v48 = vadd.f32 1.0, %v1934_v23 }
 0x450   : > { %1935 = vrcp.f32 %v1470_v48  ;;  %v1610_v22 = vpop.f32.mrb[6].mxu0 }
 0x451   : > { %v1612_v36 = vpop.f32.mrb[7].mxu0  ;;  %v1615_v37 = vmax.f32 %v1610_v22, 0.0 }
 0x452   : > { %v1616_v29 = vmax.f32 %v1612_v36, 0.0 }
 0x454   : > { %v1694_v19 = vpop.f32.mrb[8].mxu0 }
 0x455   : > { %v1699_v58 = vmax.f32 %v1694_v19, 0.0  ;;  %v1696_v46 = vpop.f32.mrb[9].mxu0 }
 0x456   : > { %v1700_v47 = vmax.f32 %v1696_v46, 0.0 }
 0x457   : > { %1701 = vst [vmem:[%s440_s20] sm:$0xff] %v1699_v58 }
 0x458   : > { %1702 = vst [vmem:[%s440_s20 + $0x8] sm:$0xff] %v1700_v47 }
 0x45a   : > { %v1936_v49 = vpop.eup %1935 }
 0x45b   : > { %1619 = vperm.xlu0 %1931, %v1936_v49  }
 0x4da   : > { %v1620_v28 = vpop.permute.xlu0 %1619 }
 0x4db   : > { %v1622_v13 = vmul.f32 %v1620_v28, %v1615_v37  ;;  %v1623_v1 = vmul.f32 %v1620_v28, %v1616_v29 }
 0x4dd   : > { %1703 = vst [vmem:[%s440_s20 + $0x10] sm:$0xff] %v1622_v13  ;;  %1704 = vst [vmem:[%s440_s20 + $0x18] sm:$0xff] %v1623_v1 }
 0x4de PF: > { %s23_s25 = sadd.s32 1, %s1943_s25  }
 0x4df   : > { %p20_p4 = scmp.ge.s32.totalorder %s23_s25, 4  }
 0x4e1   :  { %22 = sbr.rel (!%p20_p4) target bundleno = 1 (0x1), region = 136 }

</bundles_post_ra>
